<compile_context>
chip_gen: v7x
topology: tpu7x:2x2x1
jax: 0.10.0
libtpu: 0.0.40
codegen_flags: <defaults>
</compile_context>

<pallas_src>
import functools

import jax
import jax.numpy as jnp
from jax import lax
from jax.experimental import pallas as pl
from jax.experimental.pallas import tpu as pltpu

LN_EPS = 1e-12          # BERT LayerNorm eps
NEG_INF = -1e9

# Tile preferences (first knobs to sweep).  Wrappers adapt them per shape.
TM_PREF = 1024   # token (row) tile -- big tiles = fewer weight re-streams from HBM
TN_PREF = 768    # output-feature tile for the plain linear kernel
TK_PREF = 512    # contraction tile


def _pick_vmem_limit():
    # ~half of physical VMEM: 64 MiB on v5e/v6e (128 MiB phys), 32 MiB on v7x (64 MiB).
    try:
        phys = pltpu.get_tpu_info().vmem_capacity_bytes
    except Exception:
        phys = 64 * 1024 * 1024   # conservative fallback (treat as v7x)
    return min(96 * 1024 * 1024, phys // 2)


VMEM_LIMIT = _pick_vmem_limit()


def _round_up(x, m):
    return ((x + m - 1) // m) * m


def _row_tile(m, preferred=TM_PREF):
    """Token-dim tile + padded row count (pad instead of a whole-dim fallback)."""
    tm = min(preferred, _round_up(m, 8))
    return tm, _round_up(m, tm)


def _col_tile(dim, preferred):
    """Largest 128-aligned divisor of `dim` <= preferred; whole dim when it is small."""
    if dim <= preferred:
        return dim
    d = (preferred // 128) * 128
    while d >= 128:
        if dim % d == 0:
            return d
        d -= 128
    # TODO(synk): pad ragged large feature dims instead of taking them whole.
    return dim


def _pad_rows(x, m_padded):
    m = x.shape[0]
    return x if m == m_padded else jnp.pad(x, ((0, m_padded - m), (0, 0)))


# ----------------------------- Pallas kernels --------------------------------

def _linear_kernel(x_ref, w_ref, b_ref, o_ref, acc_ref, *, n_k, activation):
    # Tiled o = act(x @ w + b); grid = (M//tm, N//tn, K//tk), reduction axis last.
    @pl.when(pl.program_id(2) == 0)
    def _():
        acc_ref[...] = jnp.zeros_like(acc_ref)

    acc_ref[...] += jnp.dot(x_ref[...], w_ref[...],
                            preferred_element_type=jnp.float32)

    @pl.when(pl.program_id(2) == n_k - 1)
    def _():
        y = acc_ref[...] + b_ref[...].astype(jnp.float32)
        if activation == "gelu":
            y = jax.nn.gelu(y, approximate=True)
        o_ref[...] = y.astype(o_ref.dtype)


def _linear_add_ln_kernel(x_ref, w_ref, b_ref, res_ref, g_ref, beta_ref,
                          o_ref, acc_ref, *, n_k):
    # Tiled o = LayerNorm(x @ w + b + residual); N (= hidden) kept whole for the LN.
    k = pl.program_id(1)

    @pl.when(k == 0)
    def _():
        acc_ref[...] = jnp.zeros_like(acc_ref)

    acc_ref[...] += jnp.dot(x_ref[...], w_ref[...],
                            preferred_element_type=jnp.float32)

    @pl.when(k == n_k - 1)
    def _():
        y = (acc_ref[...] + b_ref[...].astype(jnp.float32)
             + res_ref[...].astype(jnp.float32))
        mu = jnp.mean(y, axis=-1, keepdims=True)
        var = jnp.mean(jnp.square(y - mu), axis=-1, keepdims=True)
        inv = lax.rsqrt(var + LN_EPS)
        out = ((y - mu) * inv * g_ref[...].astype(jnp.float32)
               + beta_ref[...].astype(jnp.float32))
        o_ref[...] = out.astype(o_ref.dtype)


def _ffn_kernel(x_ref, w1_ref, b1_ref, w2_ref, b2_ref, res_ref, g_ref, beta_ref,
                o_ref, acc_ref, *, n_i):
    # Fused FFN: LayerNorm(GELU(x@W1+b1)@W2 + b2 + residual), reducing over the
    # intermediate dimension so the (tokens, I) activation never hits HBM.
    j = pl.program_id(1)

    @pl.when(j == 0)
    def _():
        acc_ref[...] = jnp.zeros_like(acc_ref)

    h = jnp.dot(x_ref[...], w1_ref[...], preferred_element_type=jnp.float32)
    # TODO(synk): HF BERT uses exact erf-GELU; tanh-approximate GELU (f32) is used here.
    h = jax.nn.gelu(h + b1_ref[...].astype(jnp.float32), approximate=True)
    acc_ref[...] += jnp.dot(h.astype(w2_ref.dtype), w2_ref[...],
                            preferred_element_type=jnp.float32)

    @pl.when(j == n_i - 1)
    def _():
        y = (acc_ref[...] + b2_ref[...].astype(jnp.float32)
             + res_ref[...].astype(jnp.float32))
        mu = jnp.mean(y, axis=-1, keepdims=True)
        var = jnp.mean(jnp.square(y - mu), axis=-1, keepdims=True)
        inv = lax.rsqrt(var + LN_EPS)
        out = ((y - mu) * inv * g_ref[...].astype(jnp.float32)
               + beta_ref[...].astype(jnp.float32))
        o_ref[...] = out.astype(o_ref.dtype)


def _emb_ln_kernel(x_ref, pos_ref, typ_ref, g_ref, b_ref, o_ref):
    # Fused: word_emb (bf16 gather done in XLA) + pos_emb + type_emb, then LayerNorm.
    x = (x_ref[0].astype(jnp.float32) + pos_ref[...].astype(jnp.float32)
         + typ_ref[...].astype(jnp.float32))
    mu = jnp.mean(x, axis=-1, keepdims=True)
    var = jnp.mean(jnp.square(x - mu), axis=-1, keepdims=True)
    inv = lax.rsqrt(var + LN_EPS)
    o_ref[0] = ((x - mu) * inv * g_ref[...].astype(jnp.float32)
                + b_ref[...].astype(jnp.float32)).astype(o_ref.dtype)


def _attention_kernel(q_ref, k_ref, v_ref, bias_ref, o_ref, *, heads_per_blk, head_dim):
    # One (batch, head-group) tile per grid step; blocks are lane-dense (128-wide pair
    # for BERT-style head_dim=64).  The 1/sqrt(head_dim) scale is pre-folded into the
    # Q projection weights, so no score scaling happens here.
    bias = bias_ref[0].astype(jnp.float32)                      # (1, S) additive mask
    ctx = []
    for h in range(heads_per_blk):                              # short unroll (typ. 2)
        lo = h * head_dim
        q = q_ref[0, :, lo:lo + head_dim].astype(jnp.float32)   # (S, hd)
        k = k_ref[0, :, lo:lo + head_dim].astype(jnp.float32)
        v = v_ref[0, :, lo:lo + head_dim].astype(jnp.float32)
        s = lax.dot_general(q, k, (((1,), (1,)), ((), ())),
                            preferred_element_type=jnp.float32) + bias
        s = s - jnp.max(s, axis=-1, keepdims=True)
        p = jnp.exp(s)
        p = p * pl.reciprocal(jnp.sum(p, axis=-1, keepdims=True), approx=True)
        ctx.append(jnp.dot(p, v, preferred_element_type=jnp.float32))
    packed = ctx[0] if heads_per_blk == 1 else jnp.concatenate(ctx, axis=-1)
    o_ref[0] = packed.astype(o_ref.dtype)                       # single lane-dense store


# ----------------------------- wrappers ---------------------------------------

def pallas_linear(x, w, b, *, activation=None, out_dtype=None,
                  tm=TM_PREF, tn=TN_PREF, tk=TK_PREF):
    M, K = x.shape
    _, N = w.shape
    out_dtype = out_dtype or x.dtype
    tm, Mp = _row_tile(M, tm)
    tn = _col_tile(N, tn)
    tk = _col_tile(K, tk)
    n_k = K // tk
    out = pl.pallas_call(
        functools.partial(_linear_kernel, n_k=n_k, activation=activation),
        grid=(Mp // tm, N // tn, n_k),
        in_specs=[
            pl.BlockSpec((tm, tk), lambda i, j, k: (i, k)),
            pl.BlockSpec((tk, tn), lambda i, j, k: (k, j)),
            pl.BlockSpec((1, tn), lambda i, j, k: (0, j)),
        ],
        out_specs=pl.BlockSpec((tm, tn), lambda i, j, k: (i, j)),
        out_shape=jax.ShapeDtypeStruct((Mp, N), out_dtype),
        scratch_shapes=[pltpu.VMEM((tm, tn), jnp.float32)],
        compiler_params=pltpu.CompilerParams(
            dimension_semantics=("parallel", "parallel", "arbitrary"),
            vmem_limit_bytes=VMEM_LIMIT),
    )(_pad_rows(x, Mp), w, b.reshape(1, -1))
    return out if Mp == M else out[:M]


def pallas_linear_add_ln(x, w, b, residual, gamma, beta, *, tm=TM_PREF, tk=TK_PREF):
    M, K = x.shape
    _, N = w.shape          # N = hidden, kept whole for the LayerNorm epilogue
    tm, Mp = _row_tile(M, tm)
    tk = _col_tile(K, tk)
    n_k = K // tk
    out = pl.pallas_call(
        functools.partial(_linear_add_ln_kernel, n_k=n_k),
        grid=(Mp // tm, n_k),
        in_specs=[
            pl.BlockSpec((tm, tk), lambda i, k: (i, k)),
            pl.BlockSpec((tk, N), lambda i, k: (k, 0)),
            pl.BlockSpec((1, N), lambda i, k: (0, 0)),
            pl.BlockSpec((tm, N), lambda i, k: (i, 0)),
            pl.BlockSpec((1, N), lambda i, k: (0, 0)),
            pl.BlockSpec((1, N), lambda i, k: (0, 0)),
        ],
        out_specs=pl.BlockSpec((tm, N), lambda i, k: (i, 0)),
        out_shape=jax.ShapeDtypeStruct((Mp, N), residual.dtype),
        scratch_shapes=[pltpu.VMEM((tm, N), jnp.float32)],
        compiler_params=pltpu.CompilerParams(
            dimension_semantics=("parallel", "arbitrary"),
            vmem_limit_bytes=VMEM_LIMIT),
    )(_pad_rows(x, Mp), w, b.reshape(1, -1), _pad_rows(residual, Mp),
      gamma.reshape(1, -1), beta.reshape(1, -1))
    return out if Mp == M else out[:M]


def pallas_ffn_add_ln(x, w1, b1, w2, b2, residual, gamma, beta,
                      *, tm=TM_PREF, ti=TK_PREF):
    M, H = x.shape
    _, I = w1.shape
    tm, Mp = _row_tile(M, tm)
    ti = _col_tile(I, ti)
    n_i = I // ti
    out = pl.pallas_call(
        functools.partial(_ffn_kernel, n_i=n_i),
        grid=(Mp // tm, n_i),
        in_specs=[
            pl.BlockSpec((tm, H), lambda i, j: (i, 0)),
            pl.BlockSpec((H, ti), lambda i, j: (0, j)),
            pl.BlockSpec((1, ti), lambda i, j: (0, j)),
            pl.BlockSpec((ti, H), lambda i, j: (j, 0)),
            pl.BlockSpec((1, H), lambda i, j: (0, 0)),
            pl.BlockSpec((tm, H), lambda i, j: (i, 0)),
            pl.BlockSpec((1, H), lambda i, j: (0, 0)),
            pl.BlockSpec((1, H), lambda i, j: (0, 0)),
        ],
        out_specs=pl.BlockSpec((tm, H), lambda i, j: (i, 0)),
        out_shape=jax.ShapeDtypeStruct((Mp, H), residual.dtype),
        scratch_shapes=[pltpu.VMEM((tm, H), jnp.float32)],
        compiler_params=pltpu.CompilerParams(
            dimension_semantics=("parallel", "arbitrary"),
            vmem_limit_bytes=VMEM_LIMIT),
    )(_pad_rows(x, Mp), w1, b1.reshape(1, -1), w2, b2.reshape(1, -1),
      _pad_rows(residual, Mp), gamma.reshape(1, -1), beta.reshape(1, -1))
    return out if Mp == M else out[:M]


def pallas_embed_ln(word_vecs, pos_emb, type_vec, gamma, beta, *, out_dtype):
    B, S, H = word_vecs.shape
    return pl.pallas_call(
        _emb_ln_kernel,
        grid=(B,),
        in_specs=[
            pl.BlockSpec((1, S, H), lambda b: (b, 0, 0)),
            pl.BlockSpec((S, H), lambda b: (0, 0)),
            pl.BlockSpec((1, H), lambda b: (0, 0)),
            pl.BlockSpec((1, H), lambda b: (0, 0)),
            pl.BlockSpec((1, H), lambda b: (0, 0)),
        ],
        out_specs=pl.BlockSpec((1, S, H), lambda b: (b, 0, 0)),
        out_shape=jax.ShapeDtypeStruct((B, S, H), out_dtype),
        compiler_params=pltpu.CompilerParams(
            dimension_semantics=("parallel",),
            vmem_limit_bytes=VMEM_LIMIT),
    )(word_vecs, pos_emb[:S], type_vec.reshape(1, -1),
      gamma.reshape(1, -1), beta.reshape(1, -1))


def pallas_attention(qkv, mask_bias, *, num_heads):
    # qkv: (B, S, 3H) fused activation; mask_bias: (B, 1, S) additive (0 / -1e9).
    B, S, three_h = qkv.shape
    H = three_h // 3
    head_dim = H // num_heads

    # Group heads so each q/k/v/output block is lane-dense (multiple of 128 lanes).
    hpb = num_heads
    for g in range(1, num_heads + 1):
        if num_heads % g == 0 and (g * head_dim) % 128 == 0:
            hpb = g
            break
    blk_w = hpb * head_dim
    n_hblk = num_heads // hpb

    if blk_w % 128 == 0:
        # No-copy path: bind the fused (B, S, 3H) activation three times with
        # lane-offset index maps selecting the Q / K / V thirds.
        q_in = k_in = v_in = qkv
        q_map = lambda b, hb: (b, 0, hb)
        k_map = lambda b, hb: (b, 0, n_hblk + hb)
        v_map = lambda b, hb: (b, 0, 2 * n_hblk + hb)
    else:
        # Fallback for tiny/odd head widths: materialize q/k/v so each block spans
        # its array's full lane extent (keeps the (8,128) block constraint valid).
        q_in, k_in, v_in = qkv[..., :H], qkv[..., H:2 * H], qkv[..., 2 * H:]
        q_map = k_map = v_map = lambda b, hb: (b, 0, hb)

    return pl.pallas_call(
        functools.partial(_attention_kernel, heads_per_blk=hpb, head_dim=head_dim),
        grid=(B, n_hblk),
        in_specs=[
            pl.BlockSpec((1, S, blk_w), q_map),
            pl.BlockSpec((1, S, blk_w), k_map),
            pl.BlockSpec((1, S, blk_w), v_map),
            pl.BlockSpec((1, 1, S), lambda b, hb: (b, 0, 0)),
        ],
        out_specs=pl.BlockSpec((1, S, blk_w), lambda b, hb: (b, 0, hb)),
        out_shape=jax.ShapeDtypeStruct((B, S, H), qkv.dtype),
        compiler_params=pltpu.CompilerParams(
            dimension_semantics=("parallel", "parallel"),
            vmem_limit_bytes=VMEM_LIMIT),
    )(q_in, k_in, v_in, mask_bias)


# ----------------------------- model ------------------------------------------

def init_params(key, cfg):
    H, I, V, P = cfg["hidden"], cfg["intermediate"], cfg["vocab"], cfg["max_pos"]
    n_layers, num_class, n_heads = cfg["layers"], cfg["num_class"], cfg["heads"]
    head_dim = H // n_heads
    q_scale = 1.0 / (head_dim ** 0.5)          # folded into the Q projection weights
    ncls_pad = _round_up(num_class, 128)       # lane-dense classifier width

    def nrm(k, shape, scale=0.02, dtype=jnp.bfloat16):
        return (jax.random.normal(k, shape, jnp.float32) * scale).astype(dtype)

    keys = iter(jax.random.split(key, 8 + 8 * n_layers))
    cls_w = nrm(next(keys), (H, num_class))
    params = {
        "word_emb": nrm(next(keys), (V, H)),          # bf16 gather source
        "pos_emb": nrm(next(keys), (P, H)),
        "type_emb": nrm(next(keys), (2, H)),
        "emb_ln_g": jnp.ones((H,), jnp.float32),
        "emb_ln_b": jnp.zeros((H,), jnp.float32),
        # 128-padded classifier (extra columns zero; sliced back after the kernel).
        "cls_w_pad": jnp.zeros((H, ncls_pad), jnp.bfloat16).at[:, :num_class].set(cls_w),
        "cls_b_pad": jnp.zeros((ncls_pad,), jnp.float32),
        "layers": [],
    }
    for _ in range(n_layers):
        wq = nrm(next(keys), (H, H), scale=0.02 * q_scale)   # 1/sqrt(hd) pre-folded
        wk, wv = nrm(next(keys), (H, H)), nrm(next(keys), (H, H))
        layer = {
            # Fused (H, 3H) QKV weight.  NOTE: a checkpoint Q bias must be pre-scaled by
            # q_scale too (zero here).
            "wqkv": jnp.concatenate([wq, wk, wv], axis=1),
            "bqkv": jnp.zeros((3 * H,), jnp.float32),
            "wo": nrm(next(keys), (H, H)), "bo": jnp.zeros((H,), jnp.float32),
            "ln1_g": jnp.ones((H,), jnp.float32), "ln1_b": jnp.zeros((H,), jnp.float32),
            "w1": nrm(next(keys), (H, I)), "b1": jnp.zeros((I,), jnp.float32),
            "w2": nrm(next(keys), (I, H)), "b2": jnp.zeros((H,), jnp.float32),
            "ln2_g": jnp.ones((H,), jnp.float32), "ln2_b": jnp.zeros((H,), jnp.float32),
        }
        params["layers"].append(layer)
    return params


def bert_class_forward(params, input_ids, attention_mask, cfg):
    B, S = input_ids.shape
    H, nh = cfg["hidden"], cfg["heads"]
    ncls = cfg["num_class"]
    act_dtype = jnp.bfloat16     # bf16 activations on the MXU path, f32 accumulation

    # --- embeddings: bf16 gather (XLA glue), pos/type add + LayerNorm fused in one kernel
    # TODO(synk): token_type_ids hardcoded to 0 (segment A only), as in the reference call.
    word_vecs = params["word_emb"][input_ids]                  # (B, S, H) bf16
    x = pallas_embed_ln(word_vecs, params["pos_emb"], params["type_emb"][0],
                        params["emb_ln_g"], params["emb_ln_b"], out_dtype=act_dtype)
    x = x.reshape(B * S, H)

    mask_bias = ((1.0 - attention_mask.astype(jnp.float32)) * NEG_INF).reshape(B, 1, S)

    # --- encoder layers ---
    for layer in params["layers"]:
        # fused QKV projection: x read once, (H, 3H) weight, one kernel launch
        qkv = pallas_linear(x, layer["wqkv"], layer["bqkv"], out_dtype=act_dtype)
        ctx = pallas_attention(qkv.reshape(B, S, 3 * H), mask_bias, num_heads=nh)
        ctx = ctx.reshape(B * S, H)
        # attention output projection + residual + LayerNorm (fused epilogue)
        x = pallas_linear_add_ln(ctx, layer["wo"], layer["bo"], x,
                                 layer["ln1_g"], layer["ln1_b"])
        # fused FFN (GELU intermediate stays in VMEM) + residual + LayerNorm
        x = pallas_ffn_add_ln(x, layer["w1"], layer["b1"],
                              layer["w2"], layer["b2"], x,
                              layer["ln2_g"], layer["ln2_b"])

    # l3 applied per token to sequence_output (as in the reference forward);
    # BertModel's pooled output_1 is unused and not computed.  l2 = Dropout -> identity.
    logits = pallas_linear(x, params["cls_w_pad"], params["cls_b_pad"],
                           out_dtype=jnp.float32)              # (B*S, 128) lane-dense
    return logits[:, :ncls].reshape(B, S, ncls)


# ----------------------------- main --------------------------------------------

if __name__ == "__main__":
    # Small synthetic BERT: head_dim=64 (as in real BERT) so the 128-lane head-pair
    # attention path is exercised.
    cfg = dict(vocab=128, hidden=128, heads=2, layers=2,
               intermediate=512, max_pos=64, num_class=5)

    params = init_params(jax.random.PRNGKey(0), cfg)

    B, S = 2, 8
    kid, _ = jax.random.split(jax.random.PRNGKey(0))
    input_ids = jax.random.randint(kid, (B, S), 0, cfg["vocab"], dtype=jnp.int32)
    attention_mask = jnp.ones((B, S), dtype=jnp.int32).at[1, 6:].set(0)  # ragged mask

    fwd = jax.jit(lambda p, ids, m: bert_class_forward(p, ids, m, cfg))
    out = fwd(params, input_ids, attention_mask)
    jax.block_until_ready(out)
    assert out.shape == (B, S, cfg["num_class"]) and out.dtype == jnp.float32
    print("KERNEL_OK")
</pallas_src>

<mosaic_0001>
module attributes {stable_mosaic.version = 11 : i64} {
  func.func @_emb_ln_kernel(%arg0: i32, %arg1: memref<1x8x128xbf16, #tpu.memory_space<vmem>>, %arg2: memref<8x128xbf16, #tpu.memory_space<vmem>>, %arg3: memref<1x128xbf16, #tpu.memory_space<vmem>>, %arg4: memref<1x128xf32, #tpu.memory_space<vmem>>, %arg5: memref<1x128xf32, #tpu.memory_space<vmem>>, %arg6: memref<1x8x128xbf16, #tpu.memory_space<vmem>>) attributes {dimension_semantics = [#tpu.dimension_semantics<parallel>], iteration_bounds = array<i64: 2>, scalar_prefetch = 0 : i64, scratch_operands = 0 : i64, tpu.core_type = #tpu.core_type<tc>, window_params = [{transform_indices = @transform_0, window_bounds = array<i64: 1, 8, 128>}, {pipeline_mode = #tpu.pipeline_mode<synchronous>, transform_indices = @transform_1, window_bounds = array<i64: 8, 128>}, {pipeline_mode = #tpu.pipeline_mode<synchronous>, transform_indices = @transform_2, window_bounds = array<i64: 1, 128>}, {pipeline_mode = #tpu.pipeline_mode<synchronous>, transform_indices = @transform_3, window_bounds = array<i64: 1, 128>}, {pipeline_mode = #tpu.pipeline_mode<synchronous>, transform_indices = @transform_4, window_bounds = array<i64: 1, 128>}, {transform_indices = @transform_5, window_bounds = array<i64: 1, 8, 128>}]} {
    %c0 = arith.constant 0 : index
    %c0_0 = arith.constant 0 : index
    %c0_1 = arith.constant 0 : index
    %0 = vector.load %arg1[%c0, %c0_0, %c0_1] : memref<1x8x128xbf16, #tpu.memory_space<vmem>>, vector<1x8x128xbf16>
    %1 = vector.shape_cast %0 : vector<1x8x128xbf16> to vector<8x128xbf16>
    %2 = arith.extf %1 : vector<8x128xbf16> to vector<8x128xf32>
    %c0_2 = arith.constant 0 : index
    %c0_3 = arith.constant 0 : index
    %3 = vector.load %arg2[%c0_2, %c0_3] : memref<8x128xbf16, #tpu.memory_space<vmem>>, vector<8x128xbf16>
    %4 = arith.extf %3 : vector<8x128xbf16> to vector<8x128xf32>
    %5 = arith.addf %2, %4 : vector<8x128xf32>
    %c0_4 = arith.constant 0 : index
    %c0_5 = arith.constant 0 : index
    %6 = vector.load %arg3[%c0_4, %c0_5] : memref<1x128xbf16, #tpu.memory_space<vmem>>, vector<1x128xbf16>
    %7 = arith.extf %6 : vector<1x128xbf16> to vector<1x128xf32>
    %8 = vector.broadcast %7 : vector<1x128xf32> to vector<8x128xf32>
    %9 = arith.addf %5, %8 : vector<8x128xf32>
    %cst = arith.constant dense<0.000000e+00> : vector<8xf32>
    %10 = vector.multi_reduction <add>, %9, %cst [1] : vector<8x128xf32> to vector<8xf32>
    %11 = vector.shape_cast %10 : vector<8xf32> to vector<8x1xf32>
    %cst_6 = arith.constant 1.280000e+02 : f32
    %12 = vector.broadcast %cst_6 : f32 to vector<8x1xf32>
    %13 = arith.divf %11, %12 : vector<8x1xf32>
    %14 = vector.broadcast %13 : vector<8x1xf32> to vector<8x128xf32>
    %15 = arith.subf %9, %14 : vector<8x128xf32>
    %16 = arith.mulf %15, %15 : vector<8x128xf32>
    %cst_7 = arith.constant dense<0.000000e+00> : vector<8xf32>
    %17 = vector.multi_reduction <add>, %16, %cst_7 [1] : vector<8x128xf32> to vector<8xf32>
    %18 = vector.shape_cast %17 : vector<8xf32> to vector<8x1xf32>
    %cst_8 = arith.constant 1.280000e+02 : f32
    %19 = vector.broadcast %cst_8 : f32 to vector<8x1xf32>
    %20 = arith.divf %18, %19 : vector<8x1xf32>
    %cst_9 = arith.constant 9.99999996E-13 : f32
    %21 = vector.broadcast %cst_9 : f32 to vector<8x1xf32>
    %22 = arith.addf %20, %21 : vector<8x1xf32>
    %23 = math.rsqrt %22 : vector<8x1xf32>
    %24 = vector.broadcast %13 : vector<8x1xf32> to vector<8x128xf32>
    %25 = arith.subf %9, %24 : vector<8x128xf32>
    %26 = vector.broadcast %23 : vector<8x1xf32> to vector<8x128xf32>
    %27 = arith.mulf %25, %26 : vector<8x128xf32>
    %c0_10 = arith.constant 0 : index
    %c0_11 = arith.constant 0 : index
    %28 = vector.load %arg4[%c0_10, %c0_11] : memref<1x128xf32, #tpu.memory_space<vmem>>, vector<1x128xf32>
    %29 = vector.broadcast %28 : vector<1x128xf32> to vector<8x128xf32>
    %30 = arith.mulf %27, %29 : vector<8x128xf32>
    %c0_12 = arith.constant 0 : index
    %c0_13 = arith.constant 0 : index
    %31 = vector.load %arg5[%c0_12, %c0_13] : memref<1x128xf32, #tpu.memory_space<vmem>>, vector<1x128xf32>
    %32 = vector.broadcast %31 : vector<1x128xf32> to vector<8x128xf32>
    %33 = arith.addf %30, %32 : vector<8x128xf32>
    %34 = arith.truncf %33 : vector<8x128xf32> to vector<8x128xbf16>
    %c0_14 = arith.constant 0 : index
    %c0_15 = arith.constant 0 : index
    %c0_16 = arith.constant 0 : index
    %35 = vector.load %arg6[%c0_14, %c0_15, %c0_16] : memref<1x8x128xbf16, #tpu.memory_space<vmem>>, vector<1x8x128xbf16>
    %36 = vector.shape_cast %35 : vector<1x8x128xbf16> to vector<8x128xbf16>
    %37 = vector.shape_cast %34 : vector<8x128xbf16> to vector<1x8x128xbf16>
    tpu.vector_store %arg6[%c0_14, %c0_15, %c0_16], %37 {strides = array<i32>} : memref<1x8x128xbf16, #tpu.memory_space<vmem>>, vector<1x8x128xbf16>,
    return
  }
  func.func @transform_0(%arg0: i32) -> (i32, i32, i32) {
    %c0_i32 = arith.constant 0 : i32
    %c0_i32_0 = arith.constant 0 : i32
    %c0_i32_1 = arith.constant 0 : i32
    return %arg0, %c0_i32, %c0_i32_0 : i32, i32, i32
  }
  func.func @transform_1(%arg0: i32) -> (i32, i32) {
    %c0_i32 = arith.constant 0 : i32
    %c0_i32_0 = arith.constant 0 : i32
    %c0_i32_1 = arith.constant 0 : i32
    return %c0_i32, %c0_i32_0 : i32, i32
  }
  func.func @transform_2(%arg0: i32) -> (i32, i32) {
    %c0_i32 = arith.constant 0 : i32
    %c0_i32_0 = arith.constant 0 : i32
    %c0_i32_1 = arith.constant 0 : i32
    return %c0_i32, %c0_i32_0 : i32, i32
  }
  func.func @transform_3(%arg0: i32) -> (i32, i32) {
    %c0_i32 = arith.constant 0 : i32
    %c0_i32_0 = arith.constant 0 : i32
    %c0_i32_1 = arith.constant 0 : i32
    return %c0_i32, %c0_i32_0 : i32, i32
  }
  func.func @transform_4(%arg0: i32) -> (i32, i32) {
    %c0_i32 = arith.constant 0 : i32
    %c0_i32_0 = arith.constant 0 : i32
    %c0_i32_1 = arith.constant 0 : i32
    return %c0_i32, %c0_i32_0 : i32, i32
  }
  func.func @transform_5(%arg0: i32) -> (i32, i32, i32) {
    %c0_i32 = arith.constant 0 : i32
    %c0_i32_0 = arith.constant 0 : i32
    %c0_i32_1 = arith.constant 0 : i32
    return %arg0, %c0_i32, %c0_i32_0 : i32, i32, i32
  }
}

module attributes {stable_mosaic.version = 11 : i64} {
  func.func @_linear_kernel(%arg0: i32, %arg1: i32, %arg2: i32, %arg3: memref<16x128xbf16, #tpu.memory_space<vmem>>, %arg4: memref<128x384xbf16, #tpu.memory_space<vmem>>, %arg5: memref<1x384xf32, #tpu.memory_space<vmem>>, %arg6: memref<16x384xbf16, #tpu.memory_space<vmem>>, %arg7: memref<16x384xf32, #tpu.memory_space<vmem>>) attributes {dimension_semantics = [#tpu.dimension_semantics<parallel>, #tpu.dimension_semantics<parallel>, #tpu.dimension_semantics<arbitrary>], iteration_bounds = array<i64: 1, 1, 1>, scalar_prefetch = 0 : i64, scratch_operands = 1 : i64, tpu.core_type = #tpu.core_type<tc>, window_params = [{transform_indices = @transform_0, window_bounds = array<i64: 16, 128>}, {transform_indices = @transform_1, window_bounds = array<i64: 128, 384>}, {transform_indices = @transform_2, window_bounds = array<i64: 1, 384>}, {transform_indices = @transform_3, window_bounds = array<i64: 16, 384>}]} {
    %c0_i32 = arith.constant 0 : i32
    %0 = arith.cmpi eq, %arg2, %c0_i32 : i32
    %1 = arith.extui %0 : i1 to i32
    %c0_i32_0 = arith.constant 0 : i32
    %2 = arith.cmpi ne, %1, %c0_i32_0 : i32
    scf.if %2 {
      %cst_10 = arith.constant 0.000000e+00 : f32
      %12 = vector.broadcast %cst_10 : f32 to vector<16x384xf32>
      %c0_11 = arith.constant 0 : index
      %c0_12 = arith.constant 0 : index
      %13 = vector.load %arg7[%c0_11, %c0_12] : memref<16x384xf32, #tpu.memory_space<vmem>>, vector<16x384xf32>
      tpu.vector_store %arg7[%c0_11, %c0_12], %12 {strides = array<i32>} : memref<16x384xf32, #tpu.memory_space<vmem>>, vector<16x384xf32>,
    } else {
    }
    %c0 = arith.constant 0 : index
    %c0_1 = arith.constant 0 : index
    %3 = vector.load %arg7[%c0, %c0_1] : memref<16x384xf32, #tpu.memory_space<vmem>>, vector<16x384xf32>
    %c0_2 = arith.constant 0 : index
    %c0_3 = arith.constant 0 : index
    %4 = vector.load %arg3[%c0_2, %c0_3] : memref<16x128xbf16, #tpu.memory_space<vmem>>, vector<16x128xbf16>
    %c0_4 = arith.constant 0 : index
    %c0_5 = arith.constant 0 : index
    %5 = vector.load %arg4[%c0_4, %c0_5] : memref<128x384xbf16, #tpu.memory_space<vmem>>, vector<128x384xbf16>
    %cst = arith.constant dense<0.000000e+00> : vector<16x384xf32>
    %6 = tpu.matmul %4, %5, %cst {dimension_numbers = #tpu.dot_dimension_numbers<[1], [0], [0], [1], [0, 0, 1, 1], [], []>} : vector<16x128xbf16>, vector<128x384xbf16>, vector<16x384xf32> -> vector<16x384xf32>
    %7 = arith.addf %3, %6 : vector<16x384xf32>
    %c0_6 = arith.constant 0 : index
    %c0_7 = arith.constant 0 : index
    %8 = vector.load %arg7[%c0_6, %c0_7] : memref<16x384xf32, #tpu.memory_space<vmem>>, vector<16x384xf32>
    tpu.vector_store %arg7[%c0_6, %c0_7], %7 {strides = array<i32>} : memref<16x384xf32, #tpu.memory_space<vmem>>, vector<16x384xf32>,
    %c0_i32_8 = arith.constant 0 : i32
    %9 = arith.cmpi eq, %arg2, %c0_i32_8 : i32
    %10 = arith.extui %9 : i1 to i32
    %c0_i32_9 = arith.constant 0 : i32
    %11 = arith.cmpi ne, %10, %c0_i32_9 : i32
    scf.if %11 {
      %c0_10 = arith.constant 0 : index
      %c0_11 = arith.constant 0 : index
      %12 = vector.load %arg7[%c0_10, %c0_11] : memref<16x384xf32, #tpu.memory_space<vmem>>, vector<16x384xf32>
      %c0_12 = arith.constant 0 : index
      %c0_13 = arith.constant 0 : index
      %13 = vector.load %arg5[%c0_12, %c0_13] : memref<1x384xf32, #tpu.memory_space<vmem>>, vector<1x384xf32>
      %14 = vector.broadcast %13 : vector<1x384xf32> to vector<16x384xf32>
      %15 = arith.addf %12, %14 : vector<16x384xf32>
      %16 = arith.truncf %15 : vector<16x384xf32> to vector<16x384xbf16>
      %c0_14 = arith.constant 0 : index
      %c0_15 = arith.constant 0 : index
      %17 = vector.load %arg6[%c0_14, %c0_15] : memref<16x384xbf16, #tpu.memory_space<vmem>>, vector<16x384xbf16>
      tpu.vector_store %arg6[%c0_14, %c0_15], %16 {strides = array<i32>} : memref<16x384xbf16, #tpu.memory_space<vmem>>, vector<16x384xbf16>,
    } else {
    }
    return
  }
  func.func @transform_0(%arg0: i32, %arg1: i32, %arg2: i32) -> (i32, i32) {
    %c0_i32 = arith.constant 0 : i32
    return %arg0, %arg2 : i32, i32
  }
  func.func @transform_1(%arg0: i32, %arg1: i32, %arg2: i32) -> (i32, i32) {
    %c0_i32 = arith.constant 0 : i32
    return %arg2, %arg1 : i32, i32
  }
  func.func @transform_2(%arg0: i32, %arg1: i32, %arg2: i32) -> (i32, i32) {
    %c0_i32 = arith.constant 0 : i32
    %c0_i32_0 = arith.constant 0 : i32
    return %c0_i32, %arg1 : i32, i32
  }
  func.func @transform_3(%arg0: i32, %arg1: i32, %arg2: i32) -> (i32, i32) {
    %c0_i32 = arith.constant 0 : i32
    return %arg0, %arg1 : i32, i32
  }
}

module attributes {stable_mosaic.version = 11 : i64} {
  func.func @_attention_kernel(%arg0: i32, %arg1: i32, %arg2: memref<1x8x128xbf16, #tpu.memory_space<vmem>>, %arg3: memref<1x8x128xbf16, #tpu.memory_space<vmem>>, %arg4: memref<1x8x128xbf16, #tpu.memory_space<vmem>>, %arg5: memref<1x1x8xf32, #tpu.memory_space<vmem>>, %arg6: memref<1x8x128xbf16, #tpu.memory_space<vmem>>) attributes {dimension_semantics = [#tpu.dimension_semantics<parallel>, #tpu.dimension_semantics<parallel>], iteration_bounds = array<i64: 2, 1>, scalar_prefetch = 0 : i64, scratch_operands = 0 : i64, tpu.core_type = #tpu.core_type<tc>, window_params = [{transform_indices = @transform_0, window_bounds = array<i64: 1, 8, 128>}, {transform_indices = @transform_1, window_bounds = array<i64: 1, 8, 128>}, {transform_indices = @transform_2, window_bounds = array<i64: 1, 8, 128>}, {transform_indices = @transform_3, window_bounds = array<i64: 1, 1, 8>}, {transform_indices = @transform_4, window_bounds = array<i64: 1, 8, 128>}]} {
    %c0 = arith.constant 0 : index
    %c0_0 = arith.constant 0 : index
    %c0_1 = arith.constant 0 : index
    %0 = vector.load %arg5[%c0, %c0_0, %c0_1] : memref<1x1x8xf32, #tpu.memory_space<vmem>>, vector<1x1x8xf32>
    %1 = vector.shape_cast %0 : vector<1x1x8xf32> to vector<1x8xf32>
    %c0_2 = arith.constant 0 : index
    %c0_3 = arith.constant 0 : index
    %c0_4 = arith.constant 0 : index
    %2 = vector.load %arg2[%c0_2, %c0_3, %c0_4] : memref<1x8x128xbf16, #tpu.memory_space<vmem>>, vector<1x8x64xbf16>
    %3 = vector.shape_cast %2 : vector<1x8x64xbf16> to vector<8x64xbf16>
    %4 = arith.extf %3 : vector<8x64xbf16> to vector<8x64xf32>
    %c0_5 = arith.constant 0 : index
    %c0_6 = arith.constant 0 : index
    %c0_7 = arith.constant 0 : index
    %5 = vector.load %arg3[%c0_5, %c0_6, %c0_7] : memref<1x8x128xbf16, #tpu.memory_space<vmem>>, vector<1x8x64xbf16>
    %6 = vector.shape_cast %5 : vector<1x8x64xbf16> to vector<8x64xbf16>
    %7 = arith.extf %6 : vector<8x64xbf16> to vector<8x64xf32>
    %c0_8 = arith.constant 0 : index
    %c0_9 = arith.constant 0 : index
    %c0_10 = arith.constant 0 : index
    %8 = vector.load %arg4[%c0_8, %c0_9, %c0_10] : memref<1x8x128xbf16, #tpu.memory_space<vmem>>, vector<1x8x64xbf16>
    %9 = vector.shape_cast %8 : vector<1x8x64xbf16> to vector<8x64xbf16>
    %10 = arith.extf %9 : vector<8x64xbf16> to vector<8x64xf32>
    %cst = arith.constant dense<0.000000e+00> : vector<8x8xf32>
    %11 = tpu.matmul %4, %7, %cst {dimension_numbers = #tpu.dot_dimension_numbers<[1], [1], [0], [0], [0, 0, 1, 0], [], []>} : vector<8x64xf32>, vector<8x64xf32>, vector<8x8xf32> -> vector<8x8xf32>
    %12 = vector.broadcast %1 : vector<1x8xf32> to vector<8x8xf32>
    %13 = arith.addf %11, %12 : vector<8x8xf32>
    %cst_11 = arith.constant dense<0xFF800000> : vector<8xf32>
    %14 = vector.multi_reduction <maximumf>, %13, %cst_11 [1] : vector<8x8xf32> to vector<8xf32>
    %15 = vector.shape_cast %14 : vector<8xf32> to vector<8x1xf32>
    %16 = vector.broadcast %15 : vector<8x1xf32> to vector<8x8xf32>
    %17 = arith.subf %13, %16 : vector<8x8xf32>
    %18 = math.exp %17 : vector<8x8xf32>
    %cst_12 = arith.constant dense<0.000000e+00> : vector<8xf32>
    %19 = vector.multi_reduction <add>, %18, %cst_12 [1] : vector<8x8xf32> to vector<8xf32>
    %20 = vector.shape_cast %19 : vector<8xf32> to vector<8x1xf32>
    %21 = tpu.reciprocal %20 {approx = true} : vector<8x1xf32> -> vector<8x1xf32>
    %22 = vector.broadcast %21 : vector<8x1xf32> to vector<8x8xf32>
    %23 = arith.mulf %18, %22 : vector<8x8xf32>
    %cst_13 = arith.constant dense<0.000000e+00> : vector<8x64xf32>
    %24 = tpu.matmul %23, %10, %cst_13 {dimension_numbers = #tpu.dot_dimension_numbers<[1], [0], [0], [1], [0, 0, 1, 1], [], []>} : vector<8x8xf32>, vector<8x64xf32>, vector<8x64xf32> -> vector<8x64xf32>
    %c0_14 = arith.constant 0 : index
    %c0_15 = arith.constant 0 : index
    %c64 = arith.constant 64 : index
    %25 = vector.load %arg2[%c0_14, %c0_15, %c64] : memref<1x8x128xbf16, #tpu.memory_space<vmem>>, vector<1x8x64xbf16>
    %26 = vector.shape_cast %25 : vector<1x8x64xbf16> to vector<8x64xbf16>
    %27 = arith.extf %26 : vector<8x64xbf16> to vector<8x64xf32>
    %c0_16 = arith.constant 0 : index
    %c0_17 = arith.constant 0 : index
    %c64_18 = arith.constant 64 : index
    %28 = vector.load %arg3[%c0_16, %c0_17, %c64_18] : memref<1x8x128xbf16, #tpu.memory_space<vmem>>, vector<1x8x64xbf16>
    %29 = vector.shape_cast %28 : vector<1x8x64xbf16> to vector<8x64xbf16>
    %30 = arith.extf %29 : vector<8x64xbf16> to vector<8x64xf32>
    %c0_19 = arith.constant 0 : index
    %c0_20 = arith.constant 0 : index
    %c64_21 = arith.constant 64 : index
    %31 = vector.load %arg4[%c0_19, %c0_20, %c64_21] : memref<1x8x128xbf16, #tpu.memory_space<vmem>>, vector<1x8x64xbf16>
    %32 = vector.shape_cast %31 : vector<1x8x64xbf16> to vector<8x64xbf16>
    %33 = arith.extf %32 : vector<8x64xbf16> to vector<8x64xf32>
    %cst_22 = arith.constant dense<0.000000e+00> : vector<8x8xf32>
    %34 = tpu.matmul %27, %30, %cst_22 {dimension_numbers = #tpu.dot_dimension_numbers<[1], [1], [0], [0], [0, 0, 1, 0], [], []>} : vector<8x64xf32>, vector<8x64xf32>, vector<8x8xf32> -> vector<8x8xf32>
    %35 = vector.broadcast %1 : vector<1x8xf32> to vector<8x8xf32>
    %36 = arith.addf %34, %35 : vector<8x8xf32>
    %cst_23 = arith.constant dense<0xFF800000> : vector<8xf32>
    %37 = vector.multi_reduction <maximumf>, %36, %cst_23 [1] : vector<8x8xf32> to vector<8xf32>
    %38 = vector.shape_cast %37 : vector<8xf32> to vector<8x1xf32>
    %39 = vector.broadcast %38 : vector<8x1xf32> to vector<8x8xf32>
    %40 = arith.subf %36, %39 : vector<8x8xf32>
    %41 = math.exp %40 : vector<8x8xf32>
    %cst_24 = arith.constant dense<0.000000e+00> : vector<8xf32>
    %42 = vector.multi_reduction <add>, %41, %cst_24 [1] : vector<8x8xf32> to vector<8xf32>
    %43 = vector.shape_cast %42 : vector<8xf32> to vector<8x1xf32>
    %44 = tpu.reciprocal %43 {approx = true} : vector<8x1xf32> -> vector<8x1xf32>
    %45 = vector.broadcast %44 : vector<8x1xf32> to vector<8x8xf32>
    %46 = arith.mulf %41, %45 : vector<8x8xf32>
    %cst_25 = arith.constant dense<0.000000e+00> : vector<8x64xf32>
    %47 = tpu.matmul %46, %33, %cst_25 {dimension_numbers = #tpu.dot_dimension_numbers<[1], [0], [0], [1], [0, 0, 1, 1], [], []>} : vector<8x8xf32>, vector<8x64xf32>, vector<8x64xf32> -> vector<8x64xf32>
    %48 = tpu.concatenate %24, %47 in 1 : vector<8x64xf32>, vector<8x64xf32> -> vector<8x128xf32>
    %49 = arith.truncf %48 : vector<8x128xf32> to vector<8x128xbf16>
    %c0_26 = arith.constant 0 : index
    %c0_27 = arith.constant 0 : index
    %c0_28 = arith.constant 0 : index
    %50 = vector.load %arg6[%c0_26, %c0_27, %c0_28] : memref<1x8x128xbf16, #tpu.memory_space<vmem>>, vector<1x8x128xbf16>
    %51 = vector.shape_cast %50 : vector<1x8x128xbf16> to vector<8x128xbf16>
    %52 = vector.shape_cast %49 : vector<8x128xbf16> to vector<1x8x128xbf16>
    tpu.vector_store %arg6[%c0_26, %c0_27, %c0_28], %52 {strides = array<i32>} : memref<1x8x128xbf16, #tpu.memory_space<vmem>>, vector<1x8x128xbf16>,
    return
  }
  func.func @transform_0(%arg0: i32, %arg1: i32) -> (i32, i32, i32) {
    %c0_i32 = arith.constant 0 : i32
    %c0_i32_0 = arith.constant 0 : i32
    return %arg0, %c0_i32, %arg1 : i32, i32, i32
  }
  func.func @transform_1(%arg0: i32, %arg1: i32) -> (i32, i32, i32) {
    %c1_i32 = arith.constant 1 : i32
    %0 = arith.addi %c1_i32, %arg1 : i32
    %c0_i32 = arith.constant 0 : i32
    %c0_i32_0 = arith.constant 0 : i32
    return %arg0, %c0_i32, %0 : i32, i32, i32
  }
  func.func @transform_2(%arg0: i32, %arg1: i32) -> (i32, i32, i32) {
    %c2_i32 = arith.constant 2 : i32
    %0 = arith.addi %c2_i32, %arg1 : i32
    %c0_i32 = arith.constant 0 : i32
    %c0_i32_0 = arith.constant 0 : i32
    return %arg0, %c0_i32, %0 : i32, i32, i32
  }
  func.func @transform_3(%arg0: i32, %arg1: i32) -> (i32, i32, i32) {
    %c0_i32 = arith.constant 0 : i32
    %c0_i32_0 = arith.constant 0 : i32
    %c0_i32_1 = arith.constant 0 : i32
    return %arg0, %c0_i32, %c0_i32_0 : i32, i32, i32
  }
  func.func @transform_4(%arg0: i32, %arg1: i32) -> (i32, i32, i32) {
    %c0_i32 = arith.constant 0 : i32
    %c0_i32_0 = arith.constant 0 : i32
    return %arg0, %c0_i32, %arg1 : i32, i32, i32
  }
}

module attributes {stable_mosaic.version = 11 : i64} {
  func.func @_linear_add_ln_kernel(%arg0: i32, %arg1: i32, %arg2: memref<16x128xbf16, #tpu.memory_space<vmem>>, %arg3: memref<128x128xbf16, #tpu.memory_space<vmem>>, %arg4: memref<1x128xf32, #tpu.memory_space<vmem>>, %arg5: memref<16x128xbf16, #tpu.memory_space<vmem>>, %arg6: memref<1x128xf32, #tpu.memory_space<vmem>>, %arg7: memref<1x128xf32, #tpu.memory_space<vmem>>, %arg8: memref<16x128xbf16, #tpu.memory_space<vmem>>, %arg9: memref<16x128xf32, #tpu.memory_space<vmem>>) attributes {dimension_semantics = [#tpu.dimension_semantics<parallel>, #tpu.dimension_semantics<arbitrary>], iteration_bounds = array<i64: 1, 1>, scalar_prefetch = 0 : i64, scratch_operands = 1 : i64, tpu.core_type = #tpu.core_type<tc>, window_params = [{transform_indices = @transform_0, window_bounds = array<i64: 16, 128>}, {transform_indices = @transform_1, window_bounds = array<i64: 128, 128>}, {pipeline_mode = #tpu.pipeline_mode<synchronous>, transform_indices = @transform_2, window_bounds = array<i64: 1, 128>}, {transform_indices = @transform_3, window_bounds = array<i64: 16, 128>}, {pipeline_mode = #tpu.pipeline_mode<synchronous>, transform_indices = @transform_4, window_bounds = array<i64: 1, 128>}, {pipeline_mode = #tpu.pipeline_mode<synchronous>, transform_indices = @transform_5, window_bounds = array<i64: 1, 128>}, {transform_indices = @transform_6, window_bounds = array<i64: 16, 128>}]} {
    %c0_i32 = arith.constant 0 : i32
    %0 = arith.cmpi eq, %arg1, %c0_i32 : i32
    %1 = arith.extui %0 : i1 to i32
    %c0_i32_0 = arith.constant 0 : i32
    %2 = arith.cmpi ne, %1, %c0_i32_0 : i32
    scf.if %2 {
      %cst_10 = arith.constant 0.000000e+00 : f32
      %12 = vector.broadcast %cst_10 : f32 to vector<16x128xf32>
      %c0_11 = arith.constant 0 : index
      %c0_12 = arith.constant 0 : index
      %13 = vector.load %arg9[%c0_11, %c0_12] : memref<16x128xf32, #tpu.memory_space<vmem>>, vector<16x128xf32>
      tpu.vector_store %arg9[%c0_11, %c0_12], %12 {strides = array<i32>} : memref<16x128xf32, #tpu.memory_space<vmem>>, vector<16x128xf32>,
    } else {
    }
    %c0 = arith.constant 0 : index
    %c0_1 = arith.constant 0 : index
    %3 = vector.load %arg9[%c0, %c0_1] : memref<16x128xf32, #tpu.memory_space<vmem>>, vector<16x128xf32>
    %c0_2 = arith.constant 0 : index
    %c0_3 = arith.constant 0 : index
    %4 = vector.load %arg2[%c0_2, %c0_3] : memref<16x128xbf16, #tpu.memory_space<vmem>>, vector<16x128xbf16>
    %c0_4 = arith.constant 0 : index
    %c0_5 = arith.constant 0 : index
    %5 = vector.load %arg3[%c0_4, %c0_5] : memref<128x128xbf16, #tpu.memory_space<vmem>>, vector<128x128xbf16>
    %cst = arith.constant dense<0.000000e+00> : vector<16x128xf32>
    %6 = tpu.matmul %4, %5, %cst {dimension_numbers = #tpu.dot_dimension_numbers<[1], [0], [0], [1], [0, 0, 1, 1], [], []>} : vector<16x128xbf16>, vector<128x128xbf16>, vector<16x128xf32> -> vector<16x128xf32>
    %7 = arith.addf %3, %6 : vector<16x128xf32>
    %c0_6 = arith.constant 0 : index
    %c0_7 = arith.constant 0 : index
    %8 = vector.load %arg9[%c0_6, %c0_7] : memref<16x128xf32, #tpu.memory_space<vmem>>, vector<16x128xf32>
    tpu.vector_store %arg9[%c0_6, %c0_7], %7 {strides = array<i32>} : memref<16x128xf32, #tpu.memory_space<vmem>>, vector<16x128xf32>,
    %c0_i32_8 = arith.constant 0 : i32
    %9 = arith.cmpi eq, %arg1, %c0_i32_8 : i32
    %10 = arith.extui %9 : i1 to i32
    %c0_i32_9 = arith.constant 0 : i32
    %11 = arith.cmpi ne, %10, %c0_i32_9 : i32
    scf.if %11 {
      %c0_10 = arith.constant 0 : index
      %c0_11 = arith.constant 0 : index
      %12 = vector.load %arg9[%c0_10, %c0_11] : memref<16x128xf32, #tpu.memory_space<vmem>>, vector<16x128xf32>
      %c0_12 = arith.constant 0 : index
      %c0_13 = arith.constant 0 : index
      %13 = vector.load %arg4[%c0_12, %c0_13] : memref<1x128xf32, #tpu.memory_space<vmem>>, vector<1x128xf32>
      %14 = vector.broadcast %13 : vector<1x128xf32> to vector<16x128xf32>
      %15 = arith.addf %12, %14 : vector<16x128xf32>
      %c0_14 = arith.constant 0 : index
      %c0_15 = arith.constant 0 : index
      %16 = vector.load %arg5[%c0_14, %c0_15] : memref<16x128xbf16, #tpu.memory_space<vmem>>, vector<16x128xbf16>
      %17 = arith.extf %16 : vector<16x128xbf16> to vector<16x128xf32>
      %18 = arith.addf %15, %17 : vector<16x128xf32>
      %cst_16 = arith.constant dense<0.000000e+00> : vector<16xf32>
      %19 = vector.multi_reduction <add>, %18, %cst_16 [1] : vector<16x128xf32> to vector<16xf32>
      %20 = vector.shape_cast %19 : vector<16xf32> to vector<16x1xf32>
      %cst_17 = arith.constant 1.280000e+02 : f32
      %21 = vector.broadcast %cst_17 : f32 to vector<16x1xf32>
      %22 = arith.divf %20, %21 : vector<16x1xf32>
      %23 = vector.broadcast %22 : vector<16x1xf32> to vector<16x128xf32>
      %24 = arith.subf %18, %23 : vector<16x128xf32>
      %25 = arith.mulf %24, %24 : vector<16x128xf32>
      %cst_18 = arith.constant dense<0.000000e+00> : vector<16xf32>
      %26 = vector.multi_reduction <add>, %25, %cst_18 [1] : vector<16x128xf32> to vector<16xf32>
      %27 = vector.shape_cast %26 : vector<16xf32> to vector<16x1xf32>
      %cst_19 = arith.constant 1.280000e+02 : f32
      %28 = vector.broadcast %cst_19 : f32 to vector<16x1xf32>
      %29 = arith.divf %27, %28 : vector<16x1xf32>
      %cst_20 = arith.constant 9.99999996E-13 : f32
      %30 = vector.broadcast %cst_20 : f32 to vector<16x1xf32>
      %31 = arith.addf %29, %30 : vector<16x1xf32>
      %32 = math.rsqrt %31 : vector<16x1xf32>
      %33 = vector.broadcast %22 : vector<16x1xf32> to vector<16x128xf32>
      %34 = arith.subf %18, %33 : vector<16x128xf32>
      %35 = vector.broadcast %32 : vector<16x1xf32> to vector<16x128xf32>
      %36 = arith.mulf %34, %35 : vector<16x128xf32>
      %c0_21 = arith.constant 0 : index
      %c0_22 = arith.constant 0 : index
      %37 = vector.load %arg6[%c0_21, %c0_22] : memref<1x128xf32, #tpu.memory_space<vmem>>, vector<1x128xf32>
      %38 = vector.broadcast %37 : vector<1x128xf32> to vector<16x128xf32>
      %39 = arith.mulf %36, %38 : vector<16x128xf32>
      %c0_23 = arith.constant 0 : index
      %c0_24 = arith.constant 0 : index
      %40 = vector.load %arg7[%c0_23, %c0_24] : memref<1x128xf32, #tpu.memory_space<vmem>>, vector<1x128xf32>
      %41 = vector.broadcast %40 : vector<1x128xf32> to vector<16x128xf32>
      %42 = arith.addf %39, %41 : vector<16x128xf32>
      %43 = arith.truncf %42 : vector<16x128xf32> to vector<16x128xbf16>
      %c0_25 = arith.constant 0 : index
      %c0_26 = arith.constant 0 : index
      %44 = vector.load %arg8[%c0_25, %c0_26] : memref<16x128xbf16, #tpu.memory_space<vmem>>, vector<16x128xbf16>
      tpu.vector_store %arg8[%c0_25, %c0_26], %43 {strides = array<i32>} : memref<16x128xbf16, #tpu.memory_space<vmem>>, vector<16x128xbf16>,
    } else {
    }
    return
  }
  func.func @transform_0(%arg0: i32, %arg1: i32) -> (i32, i32) {
    %c0_i32 = arith.constant 0 : i32
    return %arg0, %arg1 : i32, i32
  }
  func.func @transform_1(%arg0: i32, %arg1: i32) -> (i32, i32) {
    %c0_i32 = arith.constant 0 : i32
    %c0_i32_0 = arith.constant 0 : i32
    return %arg1, %c0_i32 : i32, i32
  }
  func.func @transform_2(%arg0: i32, %arg1: i32) -> (i32, i32) {
    %c0_i32 = arith.constant 0 : i32
    %c0_i32_0 = arith.constant 0 : i32
    %c0_i32_1 = arith.constant 0 : i32
    return %c0_i32, %c0_i32_0 : i32, i32
  }
  func.func @transform_3(%arg0: i32, %arg1: i32) -> (i32, i32) {
    %c0_i32 = arith.constant 0 : i32
    %c0_i32_0 = arith.constant 0 : i32
    return %arg0, %c0_i32 : i32, i32
  }
  func.func @transform_4(%arg0: i32, %arg1: i32) -> (i32, i32) {
    %c0_i32 = arith.constant 0 : i32
    %c0_i32_0 = arith.constant 0 : i32
    %c0_i32_1 = arith.constant 0 : i32
    return %c0_i32, %c0_i32_0 : i32, i32
  }
  func.func @transform_5(%arg0: i32, %arg1: i32) -> (i32, i32) {
    %c0_i32 = arith.constant 0 : i32
    %c0_i32_0 = arith.constant 0 : i32
    %c0_i32_1 = arith.constant 0 : i32
    return %c0_i32, %c0_i32_0 : i32, i32
  }
  func.func @transform_6(%arg0: i32, %arg1: i32) -> (i32, i32) {
    %c0_i32 = arith.constant 0 : i32
    %c0_i32_0 = arith.constant 0 : i32
    return %arg0, %c0_i32 : i32, i32
  }
}

module attributes {stable_mosaic.version = 11 : i64} {
  func.func @_ffn_kernel(%arg0: i32, %arg1: i32, %arg2: memref<16x128xbf16, #tpu.memory_space<vmem>>, %arg3: memref<128x512xbf16, #tpu.memory_space<vmem>>, %arg4: memref<1x512xf32, #tpu.memory_space<vmem>>, %arg5: memref<512x128xbf16, #tpu.memory_space<vmem>>, %arg6: memref<1x128xf32, #tpu.memory_space<vmem>>, %arg7: memref<16x128xbf16, #tpu.memory_space<vmem>>, %arg8: memref<1x128xf32, #tpu.memory_space<vmem>>, %arg9: memref<1x128xf32, #tpu.memory_space<vmem>>, %arg10: memref<16x128xbf16, #tpu.memory_space<vmem>>, %arg11: memref<16x128xf32, #tpu.memory_space<vmem>>) attributes {dimension_semantics = [#tpu.dimension_semantics<parallel>, #tpu.dimension_semantics<arbitrary>], iteration_bounds = array<i64: 1, 1>, scalar_prefetch = 0 : i64, scratch_operands = 1 : i64, tpu.core_type = #tpu.core_type<tc>, window_params = [{transform_indices = @transform_0, window_bounds = array<i64: 16, 128>}, {transform_indices = @transform_1, window_bounds = array<i64: 128, 512>}, {transform_indices = @transform_2, window_bounds = array<i64: 1, 512>}, {transform_indices = @transform_3, window_bounds = array<i64: 512, 128>}, {pipeline_mode = #tpu.pipeline_mode<synchronous>, transform_indices = @transform_4, window_bounds = array<i64: 1, 128>}, {transform_indices = @transform_5, window_bounds = array<i64: 16, 128>}, {pipeline_mode = #tpu.pipeline_mode<synchronous>, transform_indices = @transform_6, window_bounds = array<i64: 1, 128>}, {pipeline_mode = #tpu.pipeline_mode<synchronous>, transform_indices = @transform_7, window_bounds = array<i64: 1, 128>}, {transform_indices = @transform_8, window_bounds = array<i64: 16, 128>}]} {
    %c0_i32 = arith.constant 0 : i32
    %0 = arith.cmpi eq, %arg1, %c0_i32 : i32
    %1 = arith.extui %0 : i1 to i32
    %c0_i32_0 = arith.constant 0 : i32
    %2 = arith.cmpi ne, %1, %c0_i32_0 : i32
    scf.if %2 {
      %cst_19 = arith.constant 0.000000e+00 : f32
      %31 = vector.broadcast %cst_19 : f32 to vector<16x128xf32>
      %c0_20 = arith.constant 0 : index
      %c0_21 = arith.constant 0 : index
      %32 = vector.load %arg11[%c0_20, %c0_21] : memref<16x128xf32, #tpu.memory_space<vmem>>, vector<16x128xf32>
      tpu.vector_store %arg11[%c0_20, %c0_21], %31 {strides = array<i32>} : memref<16x128xf32, #tpu.memory_space<vmem>>, vector<16x128xf32>,
    } else {
    }
    %c0 = arith.constant 0 : index
    %c0_1 = arith.constant 0 : index
    %3 = vector.load %arg2[%c0, %c0_1] : memref<16x128xbf16, #tpu.memory_space<vmem>>, vector<16x128xbf16>
    %c0_2 = arith.constant 0 : index
    %c0_3 = arith.constant 0 : index
    %4 = vector.load %arg3[%c0_2, %c0_3] : memref<128x512xbf16, #tpu.memory_space<vmem>>, vector<128x512xbf16>
    %cst = arith.constant dense<0.000000e+00> : vector<16x512xf32>
    %5 = tpu.matmul %3, %4, %cst {dimension_numbers = #tpu.dot_dimension_numbers<[1], [0], [0], [1], [0, 0, 1, 1], [], []>} : vector<16x128xbf16>, vector<128x512xbf16>, vector<16x512xf32> -> vector<16x512xf32>
    %c0_4 = arith.constant 0 : index
    %c0_5 = arith.constant 0 : index
    %6 = vector.load %arg4[%c0_4, %c0_5] : memref<1x512xf32, #tpu.memory_space<vmem>>, vector<1x512xf32>
    %7 = vector.broadcast %6 : vector<1x512xf32> to vector<16x512xf32>
    %8 = arith.addf %5, %7 : vector<16x512xf32>
    %9 = arith.mulf %8, %8 : vector<16x512xf32>
    %10 = arith.mulf %8, %9 : vector<16x512xf32>
    %cst_6 = arith.constant 4.471500e-02 : f32
    %11 = vector.broadcast %cst_6 : f32 to vector<16x512xf32>
    %12 = arith.mulf %11, %10 : vector<16x512xf32>
    %13 = arith.addf %8, %12 : vector<16x512xf32>
    %cst_7 = arith.constant 0.797884583 : f32
    %14 = vector.broadcast %cst_7 : f32 to vector<16x512xf32>
    %15 = arith.mulf %14, %13 : vector<16x512xf32>
    %16 = math.tanh %15 : vector<16x512xf32>
    %cst_8 = arith.constant 1.000000e+00 : f32
    %17 = vector.broadcast %cst_8 : f32 to vector<16x512xf32>
    %18 = arith.addf %17, %16 : vector<16x512xf32>
    %cst_9 = arith.constant 5.000000e-01 : f32
    %19 = vector.broadcast %cst_9 : f32 to vector<16x512xf32>
    %20 = arith.mulf %19, %18 : vector<16x512xf32>
    %21 = arith.mulf %8, %20 : vector<16x512xf32>
    %c0_10 = arith.constant 0 : index
    %c0_11 = arith.constant 0 : index
    %22 = vector.load %arg11[%c0_10, %c0_11] : memref<16x128xf32, #tpu.memory_space<vmem>>, vector<16x128xf32>
    %23 = arith.truncf %21 : vector<16x512xf32> to vector<16x512xbf16>
    %c0_12 = arith.constant 0 : index
    %c0_13 = arith.constant 0 : index
    %24 = vector.load %arg5[%c0_12, %c0_13] : memref<512x128xbf16, #tpu.memory_space<vmem>>, vector<512x128xbf16>
    %cst_14 = arith.constant dense<0.000000e+00> : vector<16x128xf32>
    %25 = tpu.matmul %23, %24, %cst_14 {dimension_numbers = #tpu.dot_dimension_numbers<[1], [0], [0], [1], [0, 0, 1, 1], [], []>} : vector<16x512xbf16>, vector<512x128xbf16>, vector<16x128xf32> -> vector<16x128xf32>
    %26 = arith.addf %22, %25 : vector<16x128xf32>
    %c0_15 = arith.constant 0 : index
    %c0_16 = arith.constant 0 : index
    %27 = vector.load %arg11[%c0_15, %c0_16] : memref<16x128xf32, #tpu.memory_space<vmem>>, vector<16x128xf32>
    tpu.vector_store %arg11[%c0_15, %c0_16], %26 {strides = array<i32>} : memref<16x128xf32, #tpu.memory_space<vmem>>, vector<16x128xf32>,
    %c0_i32_17 = arith.constant 0 : i32
    %28 = arith.cmpi eq, %arg1, %c0_i32_17 : i32
    %29 = arith.extui %28 : i1 to i32
    %c0_i32_18 = arith.constant 0 : i32
    %30 = arith.cmpi ne, %29, %c0_i32_18 : i32
    scf.if %30 {
      %c0_19 = arith.constant 0 : index
      %c0_20 = arith.constant 0 : index
      %31 = vector.load %arg11[%c0_19, %c0_20] : memref<16x128xf32, #tpu.memory_space<vmem>>, vector<16x128xf32>
      %c0_21 = arith.constant 0 : index
      %c0_22 = arith.constant 0 : index
      %32 = vector.load %arg6[%c0_21, %c0_22] : memref<1x128xf32, #tpu.memory_space<vmem>>, vector<1x128xf32>
      %33 = vector.broadcast %32 : vector<1x128xf32> to vector<16x128xf32>
      %34 = arith.addf %31, %33 : vector<16x128xf32>
      %c0_23 = arith.constant 0 : index
      %c0_24 = arith.constant 0 : index
      %35 = vector.load %arg7[%c0_23, %c0_24] : memref<16x128xbf16, #tpu.memory_space<vmem>>, vector<16x128xbf16>
      %36 = arith.extf %35 : vector<16x128xbf16> to vector<16x128xf32>
      %37 = arith.addf %34, %36 : vector<16x128xf32>
      %cst_25 = arith.constant dense<0.000000e+00> : vector<16xf32>
      %38 = vector.multi_reduction <add>, %37, %cst_25 [1] : vector<16x128xf32> to vector<16xf32>
      %39 = vector.shape_cast %38 : vector<16xf32> to vector<16x1xf32>
      %cst_26 = arith.constant 1.280000e+02 : f32
      %40 = vector.broadcast %cst_26 : f32 to vector<16x1xf32>
      %41 = arith.divf %39, %40 : vector<16x1xf32>
      %42 = vector.broadcast %41 : vector<16x1xf32> to vector<16x128xf32>
      %43 = arith.subf %37, %42 : vector<16x128xf32>
      %44 = arith.mulf %43, %43 : vector<16x128xf32>
      %cst_27 = arith.constant dense<0.000000e+00> : vector<16xf32>
      %45 = vector.multi_reduction <add>, %44, %cst_27 [1] : vector<16x128xf32> to vector<16xf32>
      %46 = vector.shape_cast %45 : vector<16xf32> to vector<16x1xf32>
      %cst_28 = arith.constant 1.280000e+02 : f32
      %47 = vector.broadcast %cst_28 : f32 to vector<16x1xf32>
      %48 = arith.divf %46, %47 : vector<16x1xf32>
      %cst_29 = arith.constant 9.99999996E-13 : f32
      %49 = vector.broadcast %cst_29 : f32 to vector<16x1xf32>
      %50 = arith.addf %48, %49 : vector<16x1xf32>
      %51 = math.rsqrt %50 : vector<16x1xf32>
      %52 = vector.broadcast %41 : vector<16x1xf32> to vector<16x128xf32>
      %53 = arith.subf %37, %52 : vector<16x128xf32>
      %54 = vector.broadcast %51 : vector<16x1xf32> to vector<16x128xf32>
      %55 = arith.mulf %53, %54 : vector<16x128xf32>
      %c0_30 = arith.constant 0 : index
      %c0_31 = arith.constant 0 : index
      %56 = vector.load %arg8[%c0_30, %c0_31] : memref<1x128xf32, #tpu.memory_space<vmem>>, vector<1x128xf32>
      %57 = vector.broadcast %56 : vector<1x128xf32> to vector<16x128xf32>
      %58 = arith.mulf %55, %57 : vector<16x128xf32>
      %c0_32 = arith.constant 0 : index
      %c0_33 = arith.constant 0 : index
      %59 = vector.load %arg9[%c0_32, %c0_33] : memref<1x128xf32, #tpu.memory_space<vmem>>, vector<1x128xf32>
      %60 = vector.broadcast %59 : vector<1x128xf32> to vector<16x128xf32>
      %61 = arith.addf %58, %60 : vector<16x128xf32>
      %62 = arith.truncf %61 : vector<16x128xf32> to vector<16x128xbf16>
      %c0_34 = arith.constant 0 : index
      %c0_35 = arith.constant 0 : index
      %63 = vector.load %arg10[%c0_34, %c0_35] : memref<16x128xbf16, #tpu.memory_space<vmem>>, vector<16x128xbf16>
      tpu.vector_store %arg10[%c0_34, %c0_35], %62 {strides = array<i32>} : memref<16x128xbf16, #tpu.memory_space<vmem>>, vector<16x128xbf16>,
    } else {
    }
    return
  }
  func.func @transform_0(%arg0: i32, %arg1: i32) -> (i32, i32) {
    %c0_i32 = arith.constant 0 : i32
    %c0_i32_0 = arith.constant 0 : i32
    return %arg0, %c0_i32 : i32, i32
  }
  func.func @transform_1(%arg0: i32, %arg1: i32) -> (i32, i32) {
    %c0_i32 = arith.constant 0 : i32
    %c0_i32_0 = arith.constant 0 : i32
    return %c0_i32, %arg1 : i32, i32
  }
  func.func @transform_2(%arg0: i32, %arg1: i32) -> (i32, i32) {
    %c0_i32 = arith.constant 0 : i32
    %c0_i32_0 = arith.constant 0 : i32
    return %c0_i32, %arg1 : i32, i32
  }
  func.func @transform_3(%arg0: i32, %arg1: i32) -> (i32, i32) {
    %c0_i32 = arith.constant 0 : i32
    %c0_i32_0 = arith.constant 0 : i32
    return %arg1, %c0_i32 : i32, i32
  }
  func.func @transform_4(%arg0: i32, %arg1: i32) -> (i32, i32) {
    %c0_i32 = arith.constant 0 : i32
    %c0_i32_0 = arith.constant 0 : i32
    %c0_i32_1 = arith.constant 0 : i32
    return %c0_i32, %c0_i32_0 : i32, i32
  }
  func.func @transform_5(%arg0: i32, %arg1: i32) -> (i32, i32) {
    %c0_i32 = arith.constant 0 : i32
    %c0_i32_0 = arith.constant 0 : i32
    return %arg0, %c0_i32 : i32, i32
  }
  func.func @transform_6(%arg0: i32, %arg1: i32) -> (i32, i32) {
    %c0_i32 = arith.constant 0 : i32
    %c0_i32_0 = arith.constant 0 : i32
    %c0_i32_1 = arith.constant 0 : i32
    return %c0_i32, %c0_i32_0 : i32, i32
  }
  func.func @transform_7(%arg0: i32, %arg1: i32) -> (i32, i32) {
    %c0_i32 = arith.constant 0 : i32
    %c0_i32_0 = arith.constant 0 : i32
    %c0_i32_1 = arith.constant 0 : i32
    return %c0_i32, %c0_i32_0 : i32, i32
  }
  func.func @transform_8(%arg0: i32, %arg1: i32) -> (i32, i32) {
    %c0_i32 = arith.constant 0 : i32
    %c0_i32_0 = arith.constant 0 : i32
    return %arg0, %c0_i32 : i32, i32
  }
}

module attributes {stable_mosaic.version = 11 : i64} {
  func.func @_linear_kernel(%arg0: i32, %arg1: i32, %arg2: i32, %arg3: memref<16x128xbf16, #tpu.memory_space<vmem>>, %arg4: memref<128x384xbf16, #tpu.memory_space<vmem>>, %arg5: memref<1x384xf32, #tpu.memory_space<vmem>>, %arg6: memref<16x384xbf16, #tpu.memory_space<vmem>>, %arg7: memref<16x384xf32, #tpu.memory_space<vmem>>) attributes {dimension_semantics = [#tpu.dimension_semantics<parallel>, #tpu.dimension_semantics<parallel>, #tpu.dimension_semantics<arbitrary>], iteration_bounds = array<i64: 1, 1, 1>, scalar_prefetch = 0 : i64, scratch_operands = 1 : i64, tpu.core_type = #tpu.core_type<tc>, window_params = [{transform_indices = @transform_0, window_bounds = array<i64: 16, 128>}, {transform_indices = @transform_1, window_bounds = array<i64: 128, 384>}, {transform_indices = @transform_2, window_bounds = array<i64: 1, 384>}, {transform_indices = @transform_3, window_bounds = array<i64: 16, 384>}]} {
    %c0_i32 = arith.constant 0 : i32
    %0 = arith.cmpi eq, %arg2, %c0_i32 : i32
    %1 = arith.extui %0 : i1 to i32
    %c0_i32_0 = arith.constant 0 : i32
    %2 = arith.cmpi ne, %1, %c0_i32_0 : i32
    scf.if %2 {
      %cst_10 = arith.constant 0.000000e+00 : f32
      %12 = vector.broadcast %cst_10 : f32 to vector<16x384xf32>
      %c0_11 = arith.constant 0 : index
      %c0_12 = arith.constant 0 : index
      %13 = vector.load %arg7[%c0_11, %c0_12] : memref<16x384xf32, #tpu.memory_space<vmem>>, vector<16x384xf32>
      tpu.vector_store %arg7[%c0_11, %c0_12], %12 {strides = array<i32>} : memref<16x384xf32, #tpu.memory_space<vmem>>, vector<16x384xf32>,
    } else {
    }
    %c0 = arith.constant 0 : index
    %c0_1 = arith.constant 0 : index
    %3 = vector.load %arg7[%c0, %c0_1] : memref<16x384xf32, #tpu.memory_space<vmem>>, vector<16x384xf32>
    %c0_2 = arith.constant 0 : index
    %c0_3 = arith.constant 0 : index
    %4 = vector.load %arg3[%c0_2, %c0_3] : memref<16x128xbf16, #tpu.memory_space<vmem>>, vector<16x128xbf16>
    %c0_4 = arith.constant 0 : index
    %c0_5 = arith.constant 0 : index
    %5 = vector.load %arg4[%c0_4, %c0_5] : memref<128x384xbf16, #tpu.memory_space<vmem>>, vector<128x384xbf16>
    %cst = arith.constant dense<0.000000e+00> : vector<16x384xf32>
    %6 = tpu.matmul %4, %5, %cst {dimension_numbers = #tpu.dot_dimension_numbers<[1], [0], [0], [1], [0, 0, 1, 1], [], []>} : vector<16x128xbf16>, vector<128x384xbf16>, vector<16x384xf32> -> vector<16x384xf32>
    %7 = arith.addf %3, %6 : vector<16x384xf32>
    %c0_6 = arith.constant 0 : index
    %c0_7 = arith.constant 0 : index
    %8 = vector.load %arg7[%c0_6, %c0_7] : memref<16x384xf32, #tpu.memory_space<vmem>>, vector<16x384xf32>
    tpu.vector_store %arg7[%c0_6, %c0_7], %7 {strides = array<i32>} : memref<16x384xf32, #tpu.memory_space<vmem>>, vector<16x384xf32>,
    %c0_i32_8 = arith.constant 0 : i32
    %9 = arith.cmpi eq, %arg2, %c0_i32_8 : i32
    %10 = arith.extui %9 : i1 to i32
    %c0_i32_9 = arith.constant 0 : i32
    %11 = arith.cmpi ne, %10, %c0_i32_9 : i32
    scf.if %11 {
      %c0_10 = arith.constant 0 : index
      %c0_11 = arith.constant 0 : index
      %12 = vector.load %arg7[%c0_10, %c0_11] : memref<16x384xf32, #tpu.memory_space<vmem>>, vector<16x384xf32>
      %c0_12 = arith.constant 0 : index
      %c0_13 = arith.constant 0 : index
      %13 = vector.load %arg5[%c0_12, %c0_13] : memref<1x384xf32, #tpu.memory_space<vmem>>, vector<1x384xf32>
      %14 = vector.broadcast %13 : vector<1x384xf32> to vector<16x384xf32>
      %15 = arith.addf %12, %14 : vector<16x384xf32>
      %16 = arith.truncf %15 : vector<16x384xf32> to vector<16x384xbf16>
      %c0_14 = arith.constant 0 : index
      %c0_15 = arith.constant 0 : index
      %17 = vector.load %arg6[%c0_14, %c0_15] : memref<16x384xbf16, #tpu.memory_space<vmem>>, vector<16x384xbf16>
      tpu.vector_store %arg6[%c0_14, %c0_15], %16 {strides = array<i32>} : memref<16x384xbf16, #tpu.memory_space<vmem>>, vector<16x384xbf16>,
    } else {
    }
    return
  }
  func.func @transform_0(%arg0: i32, %arg1: i32, %arg2: i32) -> (i32, i32) {
    %c0_i32 = arith.constant 0 : i32
    return %arg0, %arg2 : i32, i32
  }
  func.func @transform_1(%arg0: i32, %arg1: i32, %arg2: i32) -> (i32, i32) {
    %c0_i32 = arith.constant 0 : i32
    return %arg2, %arg1 : i32, i32
  }
  func.func @transform_2(%arg0: i32, %arg1: i32, %arg2: i32) -> (i32, i32) {
    %c0_i32 = arith.constant 0 : i32
    %c0_i32_0 = arith.constant 0 : i32
    return %c0_i32, %arg1 : i32, i32
  }
  func.func @transform_3(%arg0: i32, %arg1: i32, %arg2: i32) -> (i32, i32) {
    %c0_i32 = arith.constant 0 : i32
    return %arg0, %arg1 : i32, i32
  }
}

module attributes {stable_mosaic.version = 11 : i64} {
  func.func @_linear_kernel(%arg0: i32, %arg1: i32, %arg2: i32, %arg3: memref<16x128xbf16, #tpu.memory_space<vmem>>, %arg4: memref<128x128xbf16, #tpu.memory_space<vmem>>, %arg5: memref<1x128xf32, #tpu.memory_space<vmem>>, %arg6: memref<16x128xf32, #tpu.memory_space<vmem>>, %arg7: memref<16x128xf32, #tpu.memory_space<vmem>>) attributes {dimension_semantics = [#tpu.dimension_semantics<parallel>, #tpu.dimension_semantics<parallel>, #tpu.dimension_semantics<arbitrary>], iteration_bounds = array<i64: 1, 1, 1>, scalar_prefetch = 0 : i64, scratch_operands = 1 : i64, tpu.core_type = #tpu.core_type<tc>, window_params = [{transform_indices = @transform_0, window_bounds = array<i64: 16, 128>}, {transform_indices = @transform_1, window_bounds = array<i64: 128, 128>}, {transform_indices = @transform_2, window_bounds = array<i64: 1, 128>}, {transform_indices = @transform_3, window_bounds = array<i64: 16, 128>}]} {
    %c0_i32 = arith.constant 0 : i32
    %0 = arith.cmpi eq, %arg2, %c0_i32 : i32
    %1 = arith.extui %0 : i1 to i32
    %c0_i32_0 = arith.constant 0 : i32
    %2 = arith.cmpi ne, %1, %c0_i32_0 : i32
    scf.if %2 {
      %cst_10 = arith.constant 0.000000e+00 : f32
      %12 = vector.broadcast %cst_10 : f32 to vector<16x128xf32>
      %c0_11 = arith.constant 0 : index
      %c0_12 = arith.constant 0 : index
      %13 = vector.load %arg7[%c0_11, %c0_12] : memref<16x128xf32, #tpu.memory_space<vmem>>, vector<16x128xf32>
      tpu.vector_store %arg7[%c0_11, %c0_12], %12 {strides = array<i32>} : memref<16x128xf32, #tpu.memory_space<vmem>>, vector<16x128xf32>,
    } else {
    }
    %c0 = arith.constant 0 : index
    %c0_1 = arith.constant 0 : index
    %3 = vector.load %arg7[%c0, %c0_1] : memref<16x128xf32, #tpu.memory_space<vmem>>, vector<16x128xf32>
    %c0_2 = arith.constant 0 : index
    %c0_3 = arith.constant 0 : index
    %4 = vector.load %arg3[%c0_2, %c0_3] : memref<16x128xbf16, #tpu.memory_space<vmem>>, vector<16x128xbf16>
    %c0_4 = arith.constant 0 : index
    %c0_5 = arith.constant 0 : index
    %5 = vector.load %arg4[%c0_4, %c0_5] : memref<128x128xbf16, #tpu.memory_space<vmem>>, vector<128x128xbf16>
    %cst = arith.constant dense<0.000000e+00> : vector<16x128xf32>
    %6 = tpu.matmul %4, %5, %cst {dimension_numbers = #tpu.dot_dimension_numbers<[1], [0], [0], [1], [0, 0, 1, 1], [], []>} : vector<16x128xbf16>, vector<128x128xbf16>, vector<16x128xf32> -> vector<16x128xf32>
    %7 = arith.addf %3, %6 : vector<16x128xf32>
    %c0_6 = arith.constant 0 : index
    %c0_7 = arith.constant 0 : index
    %8 = vector.load %arg7[%c0_6, %c0_7] : memref<16x128xf32, #tpu.memory_space<vmem>>, vector<16x128xf32>
    tpu.vector_store %arg7[%c0_6, %c0_7], %7 {strides = array<i32>} : memref<16x128xf32, #tpu.memory_space<vmem>>, vector<16x128xf32>,
    %c0_i32_8 = arith.constant 0 : i32
    %9 = arith.cmpi eq, %arg2, %c0_i32_8 : i32
    %10 = arith.extui %9 : i1 to i32
    %c0_i32_9 = arith.constant 0 : i32
    %11 = arith.cmpi ne, %10, %c0_i32_9 : i32
    scf.if %11 {
      %c0_10 = arith.constant 0 : index
      %c0_11 = arith.constant 0 : index
      %12 = vector.load %arg7[%c0_10, %c0_11] : memref<16x128xf32, #tpu.memory_space<vmem>>, vector<16x128xf32>
      %c0_12 = arith.constant 0 : index
      %c0_13 = arith.constant 0 : index
      %13 = vector.load %arg5[%c0_12, %c0_13] : memref<1x128xf32, #tpu.memory_space<vmem>>, vector<1x128xf32>
      %14 = vector.broadcast %13 : vector<1x128xf32> to vector<16x128xf32>
      %15 = arith.addf %12, %14 : vector<16x128xf32>
      %c0_14 = arith.constant 0 : index
      %c0_15 = arith.constant 0 : index
      %16 = vector.load %arg6[%c0_14, %c0_15] : memref<16x128xf32, #tpu.memory_space<vmem>>, vector<16x128xf32>
      tpu.vector_store %arg6[%c0_14, %c0_15], %15 {strides = array<i32>} : memref<16x128xf32, #tpu.memory_space<vmem>>, vector<16x128xf32>,
    } else {
    }
    return
  }
  func.func @transform_0(%arg0: i32, %arg1: i32, %arg2: i32) -> (i32, i32) {
    %c0_i32 = arith.constant 0 : i32
    return %arg0, %arg2 : i32, i32
  }
  func.func @transform_1(%arg0: i32, %arg1: i32, %arg2: i32) -> (i32, i32) {
    %c0_i32 = arith.constant 0 : i32
    return %arg2, %arg1 : i32, i32
  }
  func.func @transform_2(%arg0: i32, %arg1: i32, %arg2: i32) -> (i32, i32) {
    %c0_i32 = arith.constant 0 : i32
    %c0_i32_0 = arith.constant 0 : i32
    return %c0_i32, %arg1 : i32, i32
  }
  func.func @transform_3(%arg0: i32, %arg1: i32, %arg2: i32) -> (i32, i32) {
    %c0_i32 = arith.constant 0 : i32
    return %arg0, %arg1 : i32, i32
  }
}

</mosaic_0001>

<bundles_post_ra>
// kernel: _lambda_.10
= control target key start
LH: loop header
LB: loop body
LE: loop exit
PB: predicated region body
PF: predicated region fallthrough
CT: control target
= control target key end

     0   :  { %s374_s18 = smov 0   ;;  %s406_s0 = inlined_call_operand.vmem [shape: bf16[2,8,128], index: 0, kind: input, shape index: {}]   ;;  %s407_s1 = inlined_call_operand.vmem [shape: bf16[8,128], index: 1, kind: input, shape index: {}]   ;;  %s408_s2 = inlined_call_operand.vmem [shape: bf16[1,128], index: 2, kind: input, shape index: {}]   ;;  %s409_s3 = inlined_call_operand.vmem [shape: f32[1,128], index: 3, kind: input, shape index: {}]   ;;  %s410_s4 = inlined_call_operand.vmem [shape: f32[1,128], index: 4, kind: input, shape index: {}]   ;;  %s411_s5 = inlined_call_operand.vmem [shape: bf16[2,8,128], index: 5, kind: output, shape index: {}]  }
   0x1 LB: > { %s315_s19 = sadd.s32 4294967295, %s342_s18   ;;  %p319_p0 = scmp.ge.s32.totalorder %s342_s18, 1  ;;  %s342_s18 = sphi %s374_s18, %s15_s18  }
   0x2   : > { %p186_p1 = scmp.lt.s32.totalorder %s342_s18, 3 }
   0x4   : > { %p187_p2 = pnand %p319_p0, %p186_p1 }
   0x5   : > { %p212_p3 = scmp.lt.s32.totalorder (!%p187_p2), %s315_s19, 1  ;;  %v225_v0 = vld [vmem:[%s408_s2] sm:$0x1] (!%p187_p2)  ;;  %v227_v1 = vlaneseq (!%p187_p2) }
   0x6   : > { %190 = sbr.rel (%p187_p2) target bundleno = 337 (0x151), region = 40  ;;  %v222_v2 = vld [vmem:[%s407_s1] sm:$0xf] (!%p187_p2)  ;;  %v226_v4 = vunpack.c.l.bf16 (!%p187_p2), %v225_v0 }
   0x7   : > { %v228_v3 = vshrl.u32 (!%p187_p2), %v227_v1, 7  ;;  %v223_v6 = vunpack.c.l.bf16 (!%p187_p2), %v222_v2  ;;  %v322_v20 = vld [vmem:[%s409_s3] ss:$0 sm:$0xff] (!%p187_p2) }
   0x8   : > { %v323_v22 = vld [vmem:[%s410_s4] ss:$0 sm:$0xff] (!%p187_p2) }
   0x9   : > { %v229_v5 = vsub.s32 (!%p187_p2), 0, %v228_v3 }
   0xb   : > { %v230_v9 = vrot.slane (!%p187_p2), %v226_v4, %v229_v5 }
   0xd   : > { %s413_s19 = smov (!%p212_p3, %s315_s19), 1 }
   0xe   : > { %s320_s24 = sshll.u32 %s413_s19, 2 }
   0xf   : > { %s215_s27 = scalar_lea.vmem %s406_s0, %s320_s24  ;;  %s219_s9 = scalar_lea.vmem %s411_s5, %s320_s24 }
  0x10   : > { %v220_v7 = vld [vmem:[%s215_s27] sm:$0xf] }
  0x11   : > { %v221_v8 = vunpack.c.l.bf16 %v220_v7 }
  0x13   : > { %v224_v10 = vadd.f32 %v223_v6, %v221_v8 }
  0x15   : > { %v231_v11 = vadd.f32 %v230_v9, %v224_v10 }
  0x17   : > { %232 = vadd.xlane.f32.xlu0 %v231_v11 }
  0xa4   : > { %v233_v12 = vpop.xlane.xlu0 %232 }
  0xa5   : > { %v235_v13 = vmul.f32 0.0078125, %v233_v12 }
  0xa7   : > { %v236_v14 = vsub.f32 %v231_v11, %v235_v13 }
  0xa9   : > { %v237_v15 = vmul.f32 %v236_v14, %v236_v14 }
  0xab   : > { %238 = vadd.xlane.f32.xlu0 %v237_v15 }
 0x138   : > { %v239_v16 = vpop.xlane.xlu0 %238 }
 0x139   : > { %v240_v17 = vmul.f32 0.0078125, %v239_v16 }
 0x13b   : > { %v241_v18 = vadd.f32 1e-12, %v240_v17 }
 0x13d   : > { %334 = vrsqrt.f32 %v241_v18 }
 0x147   : > { %v335_v19 = vpop.eup %334 }
 0x148   : > { %v243_v21 = vmul.f32 %v335_v19, %v236_v14 }
 0x14a   : > { %v251_v23 = vmul.f32 %v322_v20, %v243_v21 }
 0x14c   : > { %v259_v24 = vadd.f32 %v323_v22, %v251_v23 }
 0x14e   : > { %v260_v25 = vpack.c.bf16 %v259_v24, %v259_v24 }
 0x150   : > { %261 = vst [vmem:[%s219_s9] sm:$0xf] %v260_v25 }
 0x151 PF: > { %s15_s18 = sadd.s32 1, %s342_s18  }
 0x152   : > { %p12_p4 = scmp.ge.s32.totalorder %s15_s18, 4  }
 0x154   :  { %14 = sbr.rel (!%p12_p4) target bundleno = 1 (0x1), region = 70 }

// kernel: _lambda_.13
= control target key start
LH: loop header
LB: loop body
LE: loop exit
PB: predicated region body
PF: predicated region fallthrough
CT: control target
= control target key end

     0   :  { %v293_v0 = vmov 0.0   ;;  %vm294_vm0 = vmmov 0   ;;  %s372_s1 = inlined_call_operand.vmem [shape: bf16[128,128], index: 1, kind: input, shape index: {}]   ;;  %s373_s0 = inlined_call_operand.vmem [shape: bf16[16,128], index: 0, kind: input, shape index: {}]   ;;  %s374_s3 = inlined_call_operand.vmem [shape: bf16[16,128], index: 3, kind: input, shape index: {}]   ;;  %s375_s2 = inlined_call_operand.vmem [shape: f32[1,128], index: 2, kind: input, shape index: {}]   ;;  %s376_s4 = inlined_call_operand.vmem [shape: f32[1,128], index: 4, kind: input, shape index: {}]   ;;  %s377_s5 = inlined_call_operand.vmem [shape: f32[1,128], index: 5, kind: input, shape index: {}]   ;;  %s378_s6 = inlined_call_operand.vmem [shape: bf16[16,128], index: 6, kind: output, shape index: {}]  }
   0x1   :  { %258 = vmatprep.subr.bf16.mxu0 %v293_v0  ;;  %v280_v1 = vld [vmem:[%s372_s1] sm:$0xff]   ;;  %274 = vmatprep.mubr.msk.bf16.mxu0 %vm294_vm0, %v293_v0  ;;  %v281_v2 = vld [vmem:[%s372_s1 + $0x8] sm:$0xff]   ;;  %v282_v3 = vld [vmem:[%s372_s1 + $0x10] sm:$0xff]  }
   0x2   :  { %259 = vmatpush3.bf16.msra.mxu0 %v280_v1  ;;  %v283_v4 = vld [vmem:[%s372_s1 + $0x18] sm:$0xff]   ;;  %v284_v5 = vld [vmem:[%s372_s1 + $0x20] sm:$0xff]   ;;  %v285_v6 = vld [vmem:[%s372_s1 + $0x28] sm:$0xff]  }
   0x3   :  { %260 = vmatprep.subr.bf16.mxu0 %v293_v0  ;;  %v286_v7 = vld [vmem:[%s372_s1 + $0x30] sm:$0xff]   ;;  %v287_v8 = vld [vmem:[%s372_s1 + $0x38] sm:$0xff]   ;;  %v288_v9 = vld [vmem:[%s373_s0] sm:$0xff]  }
   0x4   :  { %v241_v10 = vld [vmem:[%s374_s3] sm:$0xff]  }
   0x5   :  { %v233_v11 = vld [vmem:[%s375_s2] ss:$0 sm:$0xff]  ;;  %v242_v12 = vunpack.c.l.bf16 %v241_v10  ;;  %v243_v20 = vunpack.c.h.bf16 %v241_v10 }
   0x6   :  { %261 = vmatpush3.bf16.msra.mxu0 %v281_v2  ;;  %v234_v38 = vld [vmem:[%s376_s4] ss:$0 sm:$0xff] }
   0x7   :  { %262 = vmatprep.subr.bf16.mxu0 %v293_v0  ;;  %v235_v42 = vld [vmem:[%s377_s5] ss:$0 sm:$0xff] }
   0xa   :  { %263 = vmatpush3.bf16.msra.mxu0 %v282_v3 }
   0xb   :  { %264 = vmatprep.subr.bf16.mxu0 %v293_v0 }
   0xe   :  { %265 = vmatpush3.bf16.msra.mxu0 %v283_v4 }
   0xf   :  { %266 = vmatprep.subr.bf16.mxu0 %v293_v0 }
  0x12   :  { %267 = vmatpush3.bf16.msra.mxu0 %v284_v5 }
  0x13   :  { %268 = vmatprep.subr.bf16.mxu0 %v293_v0 }
  0x16   :  { %269 = vmatpush3.bf16.msra.mxu0 %v285_v6 }
  0x17   :  { %270 = vmatprep.subr.bf16.mxu0 %v293_v0 }
  0x1a   :  { %271 = vmatpush3.bf16.msra.mxu0 %v286_v7 }
  0x1b   :  { %272 = vmatprep.subr.bf16.mxu0 %v293_v0 }
  0x1e   :  { %273 = vmatpush3.bf16.msra.mxu0 %v287_v8 }
  0x21   :  { %275 = vmatmul.mubr.bf16.vlgmr.msra.gmra.mrb[0].mxu0 %v288_v9 }
  0xf4   :  { %v138_v13 = vpop.f32.mrb[0].mxu0 }
  0xf5   :  { %v161_v14 = vadd.f32 %v233_v11, %v138_v13  ;;  %v276_v15 = vpop.f32.mrb[1].mxu0 }
  0xf6   :  { %v141_v16 = vpop.f32.mrb[2].mxu0 }
  0xf7   :  { %v162_v17 = vadd.f32 %v233_v11, %v141_v16  ;;  %v277_v18 = vpop.f32.mrb[3].mxu0  ;;  %v167_v19 = vadd.f32 %v242_v12, %v161_v14 }
  0xf9   :  { %169 = vadd.xlane.f32.xlu0 %v167_v19  ;;  %v168_v21 = vadd.f32 %v243_v20, %v162_v17 }
  0xfd   :  { %171 = vadd.xlane.f32.xlu0 %v168_v21 }
 0x186   :  { %v170_v22 = vpop.xlane.xlu0 %169 }
 0x187   :  { %v174_v23 = vmul.f32 0.0078125, %v170_v22 }
 0x189   :  { %v176_v24 = vsub.f32 %v167_v19, %v174_v23 }
 0x18a   :  { %v172_v25 = vpop.xlane.xlu0 %171 }
 0x18b   :  { %v175_v26 = vmul.f32 0.0078125, %v172_v25  ;;  %v178_v27 = vmul.f32 %v176_v24, %v176_v24 }
 0x18d   :  { %v177_v28 = vsub.f32 %v168_v21, %v175_v26  ;;  %180 = vadd.xlane.f32.xlu1 %v178_v27 }
 0x18f   :  { %v179_v29 = vmul.f32 %v177_v28, %v177_v28 }
 0x191   :  { %182 = vadd.xlane.f32.xlu1 %v179_v29 }
 0x21a   :  { %v181_v30 = vpop.xlane.xlu1 %180 }
 0x21b   :  { %v184_v31 = vmul.f32 0.0078125, %v181_v30 }
 0x21d   :  { %v186_v32 = vadd.f32 1e-12, %v184_v31 }
 0x21e   :  { %v183_v33 = vpop.xlane.xlu1 %182 }
 0x21f   :  { %289 = vrsqrt.f32 %v186_v32  ;;  %v185_v34 = vmul.f32 0.0078125, %v183_v33 }
 0x221   :  { %v187_v35 = vadd.f32 1e-12, %v185_v34 }
 0x223   :  { %291 = vrsqrt.f32 %v187_v35 }
 0x229   :  { %v290_v36 = vpop.eup %289 }
 0x22a   :  { %v190_v37 = vmul.f32 %v290_v36, %v176_v24 }
 0x22c   :  { %v199_v40 = vmul.f32 %v234_v38, %v190_v37 }
 0x22d   :  { %v292_v39 = vpop.eup %291 }
 0x22e   :  { %v191_v41 = vmul.f32 %v292_v39, %v177_v28  ;;  %v208_v44 = vadd.f32 %v235_v42, %v199_v40 }
 0x230   :  { %v200_v43 = vmul.f32 %v234_v38, %v191_v41 }
 0x232   :  { %v209_v45 = vadd.f32 %v235_v42, %v200_v43 }
 0x234   :  { %v247_v46 = vpack.c.bf16 %v209_v45, %v208_v44 }
 0x236   :  { %248 = vst [vmem:[%s378_s6] sm:$0xff] %v247_v46  }

// kernel: _lambda_.12
= control target key start
LH: loop header
LB: loop body
LE: loop exit
PB: predicated region body
PF: predicated region fallthrough
CT: control target
= control target key end

     0   :  { %s927_s15 = smov 0   ;;  %s929_s16 = smov 0   ;;  %s998_s0 = inlined_call_operand.vmem [shape: bf16[2,8,384], index: 0, kind: input, shape index: {}, may-alias: {0,1,2}]   ;;  %s999_s1 = inlined_call_operand.vmem [shape: bf16[2,8,384], index: 1, kind: input, shape index: {}, may-alias: {0,1,2}]   ;;  %s1000_s2 = inlined_call_operand.vmem [shape: bf16[2,8,384], index: 2, kind: input, shape index: {}, may-alias: {0,1,2}]   ;;  %s1001_s3 = inlined_call_operand.vmem [shape: f32[2,1,8], index: 3, kind: input, shape index: {}]   ;;  %s1002_s4 = inlined_call_operand.vmem [shape: bf16[2,8,128], index: 4, kind: output, shape index: {}]  }
   0x1   :  { %s931_s17 = smov 0  }
   0x2 LB: > { %s26_s18 = sadd.s32 1, %s893_s16  ;;  %p791_p0 = scmp.ge.s32.totalorder %s897_s17, 1  ;;  %s897_s17 = sphi %s931_s17, %s14_s17   ;;  %s893_s16 = sphi %s929_s16, %s1004_s16   ;;  %s889_s15 = sphi %s927_s15, %s1003_s15  }
   0x3   : > { %p28_p1 = scmp.ge.s32.totalorder %s26_s18, 2  ;;  %p227_p2 = scmp.lt.s32.totalorder %s897_s17, 3 }
   0x5   : > { %s1006_s18 = smov (%p28_p1, %s26_s18), 0  ;;  %p228_p3 = pnand %p791_p0, %p227_p2 }
   0x6   : > { %p279_p4 = scmp.lt.s32.totalorder (!%p228_p3), %s889_s15, 1  ;;  %v899_v0 = vmov (!%p228_p3), 0.0   ;;  %vm900_vm0 = vmmov (!%p228_p3), 0   ;;  %vm330_vm1 = vcmask (!%p228_p3), 523264   ;;  %vm407_vm2 = vcmask (!%p228_p3), 64512   ;;  %s901_s30 = smov (!%p228_p3), 64  }
   0x7   : > { %231 = sbr.rel (%p228_p3) target bundleno = 1416 (0x588), region = 36  ;;  %817 = vmatprep.subr.mxu0 (!%p228_p3), %v899_v0  ;;  %819 = vmatprep.mubr.msk.f32.mxu0 (!%p228_p3), %vm900_vm0, %v899_v0 }
   0x8   : > { %822 = vmatprep.subr.mxu1 (!%p228_p3), %v899_v0  ;;  %824 = vmatprep.mubr.msk.f32.mxu1 (!%p228_p3), %vm900_vm0, %v899_v0 }
   0xe   : > { %s1008_s15 = smov (!%p279_p4, %s889_s15), 1 }
   0xf   : > { %s950_s19 = smul.u32 12, %s1008_s15  ;;  %s309_s29 = scalar_lea.vmem %s1001_s3, %s1008_s15 }
  0x10   : > { %v796_v5 = vld [vmem:[%s309_s29] ss:$0 sm:$0xff]  ;;  %s795_s9 = sshll.u32 %s1008_s15, 2 }
  0x11   : > { %s806_s20 = sadd.s32 4, %s950_s19  ;;  %s286_s23 = scalar_lea.vmem %s998_s0, %s950_s19 }
  0x12   : > { %s295_s26 = scalar_lea.vmem %s999_s1, %s806_s20  ;;  %v318_v1 = vld [vmem:[%s286_s23] sm:$0xf]  ;;  %s808_s5 = sadd.s32 8, %s950_s19 }
  0x13   : > { %v320_v2 = vld [vmem:[%s295_s26] sm:$0xf]  ;;  %v319_v4 = vunpack.c.l.bf16 %v318_v1  ;;  %s305_s8 = scalar_lea.vmem %s1000_s2, %s808_s5  ;;  %s316_s12 = scalar_lea.vmem %s1002_s4, %s795_s9 }
  0x14   : > { %v321_v3 = vunpack.c.l.bf16 %v320_v2  ;;  %v322_v15 = vld [vmem:[%s305_s8] sm:$0xf] }
  0x15   : > { %v323_v16 = vunpack.c.l.bf16 %v322_v15 }
  0x16   : > { %818 = vmatpush3.xpose.msk.msra.mxu0 %vm330_vm1, %v321_v3  ;;  %494 = vrot.lane.b32.xlu1 %v321_v3, %s901_s30 }
  0x17   : > { %832 = vmatprep.subr.mxu0 %v899_v0  ;;  %823 = vmatpush3.msra.mxu1 %v323_v16 }
  0x18   : > { %827 = vmatprep.subr.mxu1 %v899_v0 }
  0x19   : > { %820 = vmatmul.mubr.msk.f32.vlgmr.msra.gmra.mrb[0].mxu0 %vm330_vm1, %v319_v4 }
  0x1a   : > { %834 = vmatprep.mubr.msk.f32.mxu0 %vm900_vm0, %v899_v0  ;;  %492 = vrot.lane.b32.xlu1 %v319_v4, %s901_s30 }
  0x88   : > { %v495_v18 = vpop.permute.xlu1 %494 }
  0x8c   : > { %v493_v21 = vpop.permute.xlu1 %492 }
  0xec   : > { %v403_v6 = vpop.f32.mrb[0].mxu0 }
  0xed   : > { %v404_v7 = vadd.f32 %v796_v5, %v403_v6  ;;  %v821_v8 = vpop.f32.mrb[1].mxu0 }
  0xef   : > { %v408_v9 = vsel %vm407_vm2, %v404_v7, -inf }
  0xf0   : > { %409 = vmax.xlane.f32.xlu0 %v408_v9 }
 0x17d   : > { %v410_v10 = vpop.xlane.xlu0 %409 }
 0x17e   : > { %v411_v11 = vsub.f32 %v404_v7, %v410_v10 }
 0x180   : > { %v412_v12 = vmul.f32 1.442695, %v411_v11 }
 0x182   : > { %867 = vpow2.f32 %v412_v12 }
 0x18c   : > { %v868_v13 = vpop.eup %867 }
 0x18d   : > { %v414_v14 = vsel %vm407_vm2, %v868_v13, 0.0 }
 0x18e   : > { %415 = vadd.xlane.f32.xlu0 %v414_v14 }
 0x21b   : > { %v416_v17 = vpop.xlane.xlu0 %415 }
 0x21c   : > { %869 = vrcp.f32 %v416_v17 }
 0x226   : > { %v870_v19 = vpop.eup %869 }
 0x227   : > { %v418_v20 = vmul.f32 %v870_v19, %v868_v13 }
 0x229   : > { %825 = vmatmul.mubr.msk.f32.vlgmr.msra.gmra.mrb[0].mxu1 %vm407_vm2, %v418_v20 }
 0x22a   : > { %828 = vmatpush3.xpose.msk.msra.mxu1 %vm330_vm1, %v495_v18  ;;  %829 = vmatprep.mubr.msk.f32.mxu1 %vm900_vm0, %v899_v0 }
 0x22d   : > { %830 = vmatmul.mubr.msk.f32.vlgmr.msra.gmra.mrb[2].mxu1 %vm330_vm1, %v493_v21 }
 0x2fc   : > { %v488_v22 = vpop.f32.mrb[0].mxu1 }
 0x2fd   : > { %v826_v23 = vpop.f32.mrb[1].mxu1 }
 0x300   : > { %v566_v24 = vpop.f32.mrb[2].mxu1 }
 0x301   : > { %v567_v25 = vadd.f32 %v796_v5, %v566_v24  ;;  %v831_v26 = vpop.f32.mrb[3].mxu1 }
 0x303   : > { %v570_v27 = vsel %vm407_vm2, %v567_v25, -inf }
 0x304   : > { %571 = vmax.xlane.f32.xlu0 %v570_v27 }
 0x31a   : > { %582 = vrot.lane.b32.xlu0 %v323_v16, %s901_s30 }
 0x391   : > { %v572_v28 = vpop.xlane.xlu0 %571 }
 0x392   : > { %v573_v29 = vsub.f32 %v567_v25, %v572_v28 }
 0x394   : > { %v574_v30 = vmul.f32 1.442695, %v573_v29 }
 0x395   : > { %v583_v33 = vpop.permute.xlu0 %582 }
 0x396   : > { %871 = vpow2.f32 %v574_v30  ;;  %833 = vmatpush3.msra.mxu0 %v583_v33 }
 0x3a0   : > { %v872_v31 = vpop.eup %871 }
 0x3a1   : > { %v576_v32 = vsel %vm407_vm2, %v872_v31, 0.0 }
 0x3a2   : > { %577 = vadd.xlane.f32.xlu1 %v576_v32 }
 0x42f   : > { %v578_v34 = vpop.xlane.xlu1 %577 }
 0x430   : > { %873 = vrcp.f32 %v578_v34 }
 0x43a   : > { %v874_v35 = vpop.eup %873 }
 0x43b   : > { %v580_v36 = vmul.f32 %v874_v35, %v872_v31 }
 0x43d   : > { %835 = vmatmul.mubr.msk.f32.vlgmr.msra.gmra.mrb[2].mxu0 %vm407_vm2, %v580_v36 }
 0x510   : > { %v654_v37 = vpop.f32.mrb[2].mxu0 }
 0x511   : > { %659 = vrot.lane.b32.xlu0 %v654_v37, %s901_s30  ;;  %v836_v38 = vpop.f32.mrb[3].mxu0 }
 0x583   : > { %v660_v39 = vpop.permute.xlu0 %659 }
 0x584   : > { %v662_v40 = vsel %vm330_vm1, %v488_v22, %v660_v39 }
 0x585   : > { %v663_v41 = vpack.c.bf16 %v662_v40, %v662_v40 }
 0x587   : > { %664 = vst [vmem:[%s316_s12] sm:$0xf] %v663_v41 }
 0x588 PF: > { %s14_s17 = sadd.s32 1, %s897_s17   ;;  %s1003_s15 = smov %s893_s16 }
 0x589   : > { %p11_p5 = scmp.ge.s32.totalorder %s14_s17, 4   ;;  %s1004_s16 = smov %s1006_s18 }
 0x58b   :  { %13 = sbr.rel (!%p11_p5) target bundleno = 2 (0x2), region = 75 }

// kernel: _lambda_.11
= control target key start
LH: loop header
LB: loop body
LE: loop exit
PB: predicated region body
PF: predicated region fallthrough
CT: control target
= control target key end

     0   :  { %8 = vsyncpa [#allocation4], 0  ;;  %s495_s12 = smov [#allocation3]   ;;  %s551_s0 = inlined_call_operand.vmem [shape: bf16[16,128], index: 0, kind: input, shape index: {}]   ;;  %s552_s1 = inlined_call_operand.hbm [shape: bf16[128,384], index: 1, kind: input, shape index: {}]   ;;  %s553_s2 = inlined_call_operand.vmem [shape: f32[1,384], index: 2, kind: input, shape index: {}]   ;;  %s554_s3 = inlined_call_operand.vmem [shape: bf16[16,384], index: 3, kind: output, shape index: {}]  }
   0x1   :  { %s16_s13 = sshll.u32 %s495_s12, 4  ;;  %s471_s16 = scalar_lea.hbm %s552_s1, 3072  ;;  %s17_s13 = int_to_ptr.vmem [resolvable:$true] %s16_s13 }
   0x2   :  { %p472_p0 = scmp.ne.s32.totalorder %s552_s1, %s471_s16  ;;  %p475_p1 = scmp.lt.u32.totalorder %s471_s16, %s552_s1 }
   0x4   :  { %p477_p2 = pnand %p475_p1, %p472_p0 }
   0x6   :  { %480 = shalt.err (!%p477_p2)
}
   0x7   :  { %s481_s21 = scalar_lea.vmem %s17_s13, 3072  ;;  %p486_p4 = scmp.lt.s32.totalorder %s17_s13, %s17_s13 }
   0x8   :  { %p482_p3 = scmp.ne.s32.totalorder %s17_s13, %s481_s21  ;;  %p487_p5 = scmp.lt.s32.totalorder %s481_s21, %s481_s21 }
   0xa   :  { %p488_p6 = por %p487_p5, %p486_p4 }
   0xc   :  { %p489_p7 = pnand %p488_p6, %p482_p3 }
   0xe   :  { %492 = shalt.err (!%p489_p7)
}
   0xf   :  { %s496_s22 = smov 192   ;;  %s497_s23 = smov 12  }
  0x10   :  { %22 = dma.hbm_to_vmem [thread:$0]  %s552_s1, 3072, %s17_s13, [#allocation4], %s496_s22, %s496_s22, %s497_s23  }
  0x11   :  { %493 = dma.done.wait [#allocation4], 3072  }
  0x12   :  { %494 = vsyncadd [#allocation4], 4294964224  ;;  %v498_v0 = vmov 0.0   ;;  %vm499_vm0 = vmmov 0   ;;  %v500_v1 = vmov 0   ;;  %v470_v26 = vld [vmem:[%s551_s0] sm:$0xff]   ;;  %v320_v27 = vlaneseq }
  0x13   :  { %412 = vmatprep.subr.bf16.mxu1 %v498_v0  ;;  %428 = vmatprep.mubr.msk.bf16.mxu1 %vm499_vm0, %v498_v0  ;;  %v438_v2 = vld [vmem:[#allocation3 + $0x4] ss:$12 sps:$4 sm:$0xff]   ;;  %v440_v3 = vld [vmem:[#allocation3 + $0x8] ss:$12 sps:$4 sm:$0xff]   ;;  %v441_v4 = vld [vmem:[#allocation3] ss:$12 sps:$4 sm:$0xff]  }
  0x14   :  { %245 = vmatprep.mubr.bf16.mxu0 %v500_v1  ;;  %213 = vmatprep.subr.bf16.mxu0 %v438_v2  ;;  %v442_v5 = vld [vmem:[#allocation3 + $0x1c] ss:$12 sps:$4 sm:$0xff]   ;;  %v444_v6 = vld [vmem:[#allocation3 + $0x20] ss:$12 sps:$4 sm:$0xff]   ;;  %v445_v7 = vld [vmem:[#allocation3 + $0x18] ss:$12 sps:$4 sm:$0xff]  }
  0x15   :  { %413 = vmatpush3.bf16.msra.mxu1 %v440_v3  ;;  %214 = vmatpush1.bf16.msra.mxu0 %v441_v4  ;;  %v446_v8 = vld [vmem:[#allocation3 + $0x34] ss:$12 sps:$4 sm:$0xff]   ;;  %v448_v9 = vld [vmem:[#allocation3 + $0x38] ss:$12 sps:$4 sm:$0xff]   ;;  %v449_v10 = vld [vmem:[#allocation3 + $0x30] ss:$12 sps:$4 sm:$0xff]  }
  0x16   :  { %414 = vmatprep.subr.bf16.mxu1 %v498_v0  ;;  %215 = vmatprep.subr.bf16.mxu0 %v442_v5  ;;  %v450_v11 = vld [vmem:[#allocation3 + $0x4c] ss:$12 sps:$4 sm:$0xff]   ;;  %v452_v12 = vld [vmem:[#allocation3 + $0x50] ss:$12 sps:$4 sm:$0xff]   ;;  %v453_v13 = vld [vmem:[#allocation3 + $0x48] ss:$12 sps:$4 sm:$0xff]  }
  0x17   :  { %v454_v14 = vld [vmem:[#allocation3 + $0x64] ss:$12 sps:$4 sm:$0xff]   ;;  %v456_v15 = vld [vmem:[#allocation3 + $0x68] ss:$12 sps:$4 sm:$0xff]   ;;  %v457_v16 = vld [vmem:[#allocation3 + $0x60] ss:$12 sps:$4 sm:$0xff]  }
  0x18   :  { %v458_v17 = vld [vmem:[#allocation3 + $0x7c] ss:$12 sps:$4 sm:$0xff]   ;;  %v460_v18 = vld [vmem:[#allocation3 + $0x80] ss:$12 sps:$4 sm:$0xff]   ;;  %v461_v19 = vld [vmem:[#allocation3 + $0x78] ss:$12 sps:$4 sm:$0xff]  }
  0x19   :  { %415 = vmatpush3.bf16.msra.mxu1 %v444_v6  ;;  %216 = vmatpush1.bf16.msra.mxu0 %v445_v7  ;;  %v462_v20 = vld [vmem:[#allocation3 + $0x94] ss:$12 sps:$4 sm:$0xff]   ;;  %v464_v21 = vld [vmem:[#allocation3 + $0x98] ss:$12 sps:$4 sm:$0xff]   ;;  %v465_v22 = vld [vmem:[#allocation3 + $0x90] ss:$12 sps:$4 sm:$0xff]  }
  0x1a   :  { %416 = vmatprep.subr.bf16.mxu1 %v498_v0  ;;  %217 = vmatprep.subr.bf16.mxu0 %v446_v8  ;;  %v466_v23 = vld [vmem:[#allocation3 + $0xac] ss:$12 sps:$4 sm:$0xff]   ;;  %v468_v24 = vld [vmem:[#allocation3 + $0xb0] ss:$12 sps:$4 sm:$0xff]   ;;  %v469_v25 = vld [vmem:[#allocation3 + $0xa8] ss:$12 sps:$4 sm:$0xff]  }
  0x1b   :  { %v321_v28 = vshrl.u32 %v320_v27, 7  ;;  %v318_v30 = vld [vmem:[%s553_s2] sm:$0x7] }
  0x1d   :  { %417 = vmatpush3.bf16.msra.mxu1 %v448_v9  ;;  %218 = vmatpush1.bf16.msra.mxu0 %v449_v10  ;;  %v330_v29 = vsub.s32 2, %v321_v28  ;;  %v322_v31 = vsub.s32 0, %v321_v28  ;;  %v326_v32 = vsub.s32 1, %v321_v28 }
  0x1e   :  { %418 = vmatprep.subr.bf16.mxu1 %v498_v0  ;;  %219 = vmatprep.subr.bf16.mxu0 %v450_v11 }
  0x1f   :  { %v331_v33 = vrot.slane %v318_v30, %v330_v29  ;;  %v323_v34 = vrot.slane %v318_v30, %v322_v31  ;;  %v327_v35 = vrot.slane %v318_v30, %v326_v32 }
  0x21   :  { %419 = vmatpush3.bf16.msra.mxu1 %v452_v12  ;;  %220 = vmatpush1.bf16.msra.mxu0 %v453_v13 }
  0x22   :  { %420 = vmatprep.subr.bf16.mxu1 %v498_v0  ;;  %221 = vmatprep.subr.bf16.mxu0 %v454_v14 }
  0x25   :  { %421 = vmatpush3.bf16.msra.mxu1 %v456_v15  ;;  %222 = vmatpush1.bf16.msra.mxu0 %v457_v16 }
  0x26   :  { %422 = vmatprep.subr.bf16.mxu1 %v498_v0  ;;  %223 = vmatprep.subr.bf16.mxu0 %v458_v17 }
  0x29   :  { %423 = vmatpush3.bf16.msra.mxu1 %v460_v18  ;;  %224 = vmatpush1.bf16.msra.mxu0 %v461_v19 }
  0x2a   :  { %424 = vmatprep.subr.bf16.mxu1 %v498_v0  ;;  %225 = vmatprep.subr.bf16.mxu0 %v462_v20 }
  0x2d   :  { %425 = vmatpush3.bf16.msra.mxu1 %v464_v21  ;;  %226 = vmatpush1.bf16.msra.mxu0 %v465_v22 }
  0x2e   :  { %426 = vmatprep.subr.bf16.mxu1 %v498_v0  ;;  %227 = vmatprep.subr.bf16.mxu0 %v466_v23 }
  0x31   :  { %427 = vmatpush3.bf16.msra.mxu1 %v468_v24  ;;  %228 = vmatpush1.bf16.msra.mxu0 %v469_v25 }
  0x34   :  { %429 = vmatmul.mubr.bf16.vlgmr.msra.gmra.mrb[0].mxu1 %v470_v26  ;;  %246 = vmatmul.mubr.bf16.vlgmr.msra.gmra.mrb[0].mxu0 %v470_v26 }
 0x107   :  { %v290_v36 = vpop.f32.mrb[0].mxu1  ;;  %v247_v38 = vpop.f32.mrb[0].mxu0 }
 0x108   :  { %v337_v37 = vadd.f32 %v331_v33, %v290_v36  ;;  %v430_v39 = vpop.f32.mrb[1].mxu1  ;;  %v335_v40 = vadd.f32 %v323_v34, %v247_v38  ;;  %v249_v41 = vpop.f32.mrb[1].mxu0 }
 0x109   :  { %v293_v42 = vpop.f32.mrb[2].mxu1  ;;  %v336_v44 = vadd.f32 %v327_v35, %v249_v41  ;;  %v251_v46 = vpop.f32.mrb[2].mxu0 }
 0x10a   :  { %v400_v43 = vpack.c.bf16 %v337_v37, %v337_v37  ;;  %v340_v45 = vadd.f32 %v331_v33, %v293_v42  ;;  %v431_v47 = vpop.f32.mrb[3].mxu1  ;;  %v338_v48 = vadd.f32 %v323_v34, %v251_v46  ;;  %v253_v49 = vpop.f32.mrb[3].mxu0 }
 0x10b   :  { %v399_v50 = vpack.c.bf16 %v336_v44, %v335_v40  ;;  %v339_v52 = vadd.f32 %v327_v35, %v253_v49 }
 0x10c   :  { %362 = vst [vmem:[%s554_s3 + $0x8] sm:$0xf] %v400_v43  ;;  %v402_v51 = vpack.c.bf16 %v340_v45, %v340_v45 }
 0x10d   :  { %361 = vst [vmem:[%s554_s3] sm:$0xff] %v399_v50  ;;  %v401_v53 = vpack.c.bf16 %v339_v52, %v338_v48 }
 0x10e   :  { %364 = vst [vmem:[%s554_s3 + $0x14] sm:$0xf] %v402_v51 }
 0x10f   :  { %363 = vst [vmem:[%s554_s3 + $0xc] sm:$0xff] %v401_v53 }
 0x110   :  { %369 = vsyncpa [#allocation4], 1 }

// kernel: _lambda_.19
= control target key start
LH: loop header
LB: loop body
LE: loop exit
PB: predicated region body
PF: predicated region fallthrough
CT: control target
= control target key end

     0   :  { %v210_v0 = vmov 0.0   ;;  %vm211_vm0 = vmmov 0   ;;  %s268_s1 = inlined_call_operand.vmem [shape: bf16[128,128], index: 1, kind: input, shape index: {}]   ;;  %s269_s0 = inlined_call_operand.vmem [shape: bf16[16,128], index: 0, kind: input, shape index: {}]   ;;  %s270_s2 = inlined_call_operand.vmem [shape: f32[1,128], index: 2, kind: input, shape index: {}]   ;;  %s271_s3 = inlined_call_operand.vmem [shape: f32[16,128], index: 3, kind: output, shape index: {}]  }
   0x1   :  { %179 = vmatprep.subr.bf16.mxu0 %v210_v0  ;;  %v201_v1 = vld [vmem:[%s268_s1] sm:$0xff]   ;;  %195 = vmatprep.mubr.msk.bf16.mxu0 %vm211_vm0, %v210_v0  ;;  %v202_v2 = vld [vmem:[%s268_s1 + $0x8] sm:$0xff]   ;;  %v203_v3 = vld [vmem:[%s268_s1 + $0x10] sm:$0xff]  }
   0x2   :  { %180 = vmatpush3.bf16.msra.mxu0 %v201_v1  ;;  %v204_v4 = vld [vmem:[%s268_s1 + $0x18] sm:$0xff]   ;;  %v205_v5 = vld [vmem:[%s268_s1 + $0x20] sm:$0xff]   ;;  %v206_v6 = vld [vmem:[%s268_s1 + $0x28] sm:$0xff]  }
   0x3   :  { %181 = vmatprep.subr.bf16.mxu0 %v210_v0  ;;  %v207_v7 = vld [vmem:[%s268_s1 + $0x30] sm:$0xff]   ;;  %v208_v8 = vld [vmem:[%s268_s1 + $0x38] sm:$0xff]   ;;  %v209_v9 = vld [vmem:[%s269_s0] sm:$0xff]  }
   0x4   :  { %v169_v10 = vld [vmem:[%s270_s2] ss:$0 sm:$0xff] }
   0x6   :  { %182 = vmatpush3.bf16.msra.mxu0 %v202_v2 }
   0x7   :  { %183 = vmatprep.subr.bf16.mxu0 %v210_v0 }
   0xa   :  { %184 = vmatpush3.bf16.msra.mxu0 %v203_v3 }
   0xb   :  { %185 = vmatprep.subr.bf16.mxu0 %v210_v0 }
   0xe   :  { %186 = vmatpush3.bf16.msra.mxu0 %v204_v4 }
   0xf   :  { %187 = vmatprep.subr.bf16.mxu0 %v210_v0 }
  0x12   :  { %188 = vmatpush3.bf16.msra.mxu0 %v205_v5 }
  0x13   :  { %189 = vmatprep.subr.bf16.mxu0 %v210_v0 }
  0x16   :  { %190 = vmatpush3.bf16.msra.mxu0 %v206_v6 }
  0x17   :  { %191 = vmatprep.subr.bf16.mxu0 %v210_v0 }
  0x1a   :  { %192 = vmatpush3.bf16.msra.mxu0 %v207_v7 }
  0x1b   :  { %193 = vmatprep.subr.bf16.mxu0 %v210_v0 }
  0x1e   :  { %194 = vmatpush3.bf16.msra.mxu0 %v208_v8 }
  0x21   :  { %196 = vmatmul.mubr.bf16.vlgmr.msra.gmra.mrb[0].mxu0 %v209_v9 }
  0xf4   :  { %v129_v11 = vpop.f32.mrb[0].mxu0 }
  0xf5   :  { %v152_v12 = vadd.f32 %v169_v10, %v129_v11  ;;  %v197_v13 = vpop.f32.mrb[1].mxu0 }
  0xf6   :  { %v132_v14 = vpop.f32.mrb[2].mxu0 }
  0xf7   :  { %154 = vst [vmem:[%s271_s3] sm:$0xff] %v152_v12  ;;  %v153_v15 = vadd.f32 %v169_v10, %v132_v14  ;;  %v198_v16 = vpop.f32.mrb[3].mxu0 }
  0xf9   :  { %155 = vst [vmem:[%s271_s3 + $0x8] sm:$0xff] %v153_v15 }

// kernel: _lambda_.15
= control target key start
LH: loop header
LB: loop body
LE: loop exit
PB: predicated region body
PF: predicated region fallthrough
CT: control target
= control target key end

     0   :  { %v453_v0 = vmov 0.0   ;;  %vm454_vm0 = vmmov 0   ;;  %v455_v3 = vmov 0   ;;  %v306_v27 = vlaneseq  ;;  %s566_s1 = inlined_call_operand.vmem [shape: bf16[128,384], index: 1, kind: input, shape index: {}]   ;;  %s567_s0 = inlined_call_operand.vmem [shape: bf16[16,128], index: 0, kind: input, shape index: {}]   ;;  %s568_s2 = inlined_call_operand.vmem [shape: f32[1,384], index: 2, kind: input, shape index: {}]   ;;  %s569_s3 = inlined_call_operand.vmem [shape: bf16[16,384], index: 3, kind: output, shape index: {}]  }
   0x1   :  { %397 = vmatprep.subr.bf16.mxu1 %v453_v0  ;;  %v420_v1 = vld [vmem:[%s566_s1 + $0x4] ss:$12 sps:$4 sm:$0xff]   ;;  %413 = vmatprep.mubr.msk.bf16.mxu1 %vm454_vm0, %v453_v0  ;;  %v422_v2 = vld [vmem:[%s566_s1 + $0x8] ss:$12 sps:$4 sm:$0xff]   ;;  %v423_v4 = vld [vmem:[%s566_s1] ss:$12 sps:$4 sm:$0xff]  }
   0x2   :  { %231 = vmatprep.mubr.bf16.mxu0 %v455_v3  ;;  %199 = vmatprep.subr.bf16.mxu0 %v420_v1  ;;  %v424_v5 = vld [vmem:[%s566_s1 + $0x1c] ss:$12 sps:$4 sm:$0xff]   ;;  %v426_v6 = vld [vmem:[%s566_s1 + $0x20] ss:$12 sps:$4 sm:$0xff]   ;;  %v427_v7 = vld [vmem:[%s566_s1 + $0x18] ss:$12 sps:$4 sm:$0xff]  }
   0x3   :  { %398 = vmatpush3.bf16.msra.mxu1 %v422_v2  ;;  %200 = vmatpush1.bf16.msra.mxu0 %v423_v4  ;;  %v428_v8 = vld [vmem:[%s566_s1 + $0x34] ss:$12 sps:$4 sm:$0xff]   ;;  %v430_v9 = vld [vmem:[%s566_s1 + $0x38] ss:$12 sps:$4 sm:$0xff]   ;;  %v431_v10 = vld [vmem:[%s566_s1 + $0x30] ss:$12 sps:$4 sm:$0xff]  }
   0x4   :  { %399 = vmatprep.subr.bf16.mxu1 %v453_v0  ;;  %201 = vmatprep.subr.bf16.mxu0 %v424_v5  ;;  %v432_v11 = vld [vmem:[%s566_s1 + $0x4c] ss:$12 sps:$4 sm:$0xff]   ;;  %v434_v12 = vld [vmem:[%s566_s1 + $0x50] ss:$12 sps:$4 sm:$0xff]   ;;  %v435_v13 = vld [vmem:[%s566_s1 + $0x48] ss:$12 sps:$4 sm:$0xff]  }
   0x5   :  { %v436_v14 = vld [vmem:[%s566_s1 + $0x64] ss:$12 sps:$4 sm:$0xff]   ;;  %v438_v15 = vld [vmem:[%s566_s1 + $0x68] ss:$12 sps:$4 sm:$0xff]   ;;  %v439_v16 = vld [vmem:[%s566_s1 + $0x60] ss:$12 sps:$4 sm:$0xff]  }
   0x6   :  { %v440_v17 = vld [vmem:[%s566_s1 + $0x7c] ss:$12 sps:$4 sm:$0xff]   ;;  %v442_v18 = vld [vmem:[%s566_s1 + $0x80] ss:$12 sps:$4 sm:$0xff]   ;;  %v443_v19 = vld [vmem:[%s566_s1 + $0x78] ss:$12 sps:$4 sm:$0xff]  }
   0x7   :  { %400 = vmatpush3.bf16.msra.mxu1 %v426_v6  ;;  %202 = vmatpush1.bf16.msra.mxu0 %v427_v7  ;;  %v444_v20 = vld [vmem:[%s566_s1 + $0x94] ss:$12 sps:$4 sm:$0xff]   ;;  %v446_v21 = vld [vmem:[%s566_s1 + $0x98] ss:$12 sps:$4 sm:$0xff]   ;;  %v447_v22 = vld [vmem:[%s566_s1 + $0x90] ss:$12 sps:$4 sm:$0xff]  }
   0x8   :  { %401 = vmatprep.subr.bf16.mxu1 %v453_v0  ;;  %203 = vmatprep.subr.bf16.mxu0 %v428_v8  ;;  %v448_v23 = vld [vmem:[%s566_s1 + $0xac] ss:$12 sps:$4 sm:$0xff]   ;;  %v450_v24 = vld [vmem:[%s566_s1 + $0xb0] ss:$12 sps:$4 sm:$0xff]   ;;  %v451_v25 = vld [vmem:[%s566_s1 + $0xa8] ss:$12 sps:$4 sm:$0xff]  }
   0x9   :  { %v452_v26 = vld [vmem:[%s567_s0] sm:$0xff]   ;;  %v307_v28 = vshrl.u32 %v306_v27, 7 }
   0xa   :  { %v304_v30 = vld [vmem:[%s568_s2] sm:$0x7] }
   0xb   :  { %402 = vmatpush3.bf16.msra.mxu1 %v430_v9  ;;  %204 = vmatpush1.bf16.msra.mxu0 %v431_v10  ;;  %v316_v29 = vsub.s32 2, %v307_v28  ;;  %v308_v31 = vsub.s32 0, %v307_v28  ;;  %v312_v32 = vsub.s32 1, %v307_v28 }
   0xc   :  { %403 = vmatprep.subr.bf16.mxu1 %v453_v0  ;;  %205 = vmatprep.subr.bf16.mxu0 %v432_v11 }
   0xd   :  { %v317_v33 = vrot.slane %v304_v30, %v316_v29  ;;  %v309_v34 = vrot.slane %v304_v30, %v308_v31  ;;  %v313_v35 = vrot.slane %v304_v30, %v312_v32 }
   0xf   :  { %404 = vmatpush3.bf16.msra.mxu1 %v434_v12  ;;  %206 = vmatpush1.bf16.msra.mxu0 %v435_v13 }
  0x10   :  { %405 = vmatprep.subr.bf16.mxu1 %v453_v0  ;;  %207 = vmatprep.subr.bf16.mxu0 %v436_v14 }
  0x13   :  { %406 = vmatpush3.bf16.msra.mxu1 %v438_v15  ;;  %208 = vmatpush1.bf16.msra.mxu0 %v439_v16 }
  0x14   :  { %407 = vmatprep.subr.bf16.mxu1 %v453_v0  ;;  %209 = vmatprep.subr.bf16.mxu0 %v440_v17 }
  0x17   :  { %408 = vmatpush3.bf16.msra.mxu1 %v442_v18  ;;  %210 = vmatpush1.bf16.msra.mxu0 %v443_v19 }
  0x18   :  { %409 = vmatprep.subr.bf16.mxu1 %v453_v0  ;;  %211 = vmatprep.subr.bf16.mxu0 %v444_v20 }
  0x1b   :  { %410 = vmatpush3.bf16.msra.mxu1 %v446_v21  ;;  %212 = vmatpush1.bf16.msra.mxu0 %v447_v22 }
  0x1c   :  { %411 = vmatprep.subr.bf16.mxu1 %v453_v0  ;;  %213 = vmatprep.subr.bf16.mxu0 %v448_v23 }
  0x1f   :  { %412 = vmatpush3.bf16.msra.mxu1 %v450_v24  ;;  %214 = vmatpush1.bf16.msra.mxu0 %v451_v25 }
  0x22   :  { %414 = vmatmul.mubr.bf16.vlgmr.msra.gmra.mrb[0].mxu1 %v452_v26  ;;  %232 = vmatmul.mubr.bf16.vlgmr.msra.gmra.mrb[0].mxu0 %v452_v26 }
  0xf5   :  { %v276_v36 = vpop.f32.mrb[0].mxu1  ;;  %v233_v38 = vpop.f32.mrb[0].mxu0 }
  0xf6   :  { %v323_v37 = vadd.f32 %v317_v33, %v276_v36  ;;  %v415_v39 = vpop.f32.mrb[1].mxu1  ;;  %v321_v40 = vadd.f32 %v309_v34, %v233_v38  ;;  %v235_v41 = vpop.f32.mrb[1].mxu0 }
  0xf7   :  { %v279_v42 = vpop.f32.mrb[2].mxu1  ;;  %v322_v44 = vadd.f32 %v313_v35, %v235_v41  ;;  %v237_v46 = vpop.f32.mrb[2].mxu0 }
  0xf8   :  { %v385_v43 = vpack.c.bf16 %v323_v37, %v323_v37  ;;  %v326_v45 = vadd.f32 %v317_v33, %v279_v42  ;;  %v416_v47 = vpop.f32.mrb[3].mxu1  ;;  %v324_v48 = vadd.f32 %v309_v34, %v237_v46  ;;  %v239_v49 = vpop.f32.mrb[3].mxu0 }
  0xf9   :  { %v384_v50 = vpack.c.bf16 %v322_v44, %v321_v40  ;;  %v325_v52 = vadd.f32 %v313_v35, %v239_v49 }
  0xfa   :  { %348 = vst [vmem:[%s569_s3 + $0x8] sm:$0xf] %v385_v43  ;;  %v387_v51 = vpack.c.bf16 %v326_v45, %v326_v45 }
  0xfb   :  { %347 = vst [vmem:[%s569_s3] sm:$0xff] %v384_v50  ;;  %v386_v53 = vpack.c.bf16 %v325_v52, %v324_v48 }
  0xfc   :  { %350 = vst [vmem:[%s569_s3 + $0x14] sm:$0xf] %v387_v51 }
  0xfd   :  { %349 = vst [vmem:[%s569_s3 + $0xc] sm:$0xff] %v386_v53 }

// kernel: _lambda_.14
= control target key start
LH: loop header
LB: loop body
LE: loop exit
PB: predicated region body
PF: predicated region fallthrough
CT: control target
= control target key end

     0   :  { %v1066_v1 = vmov 0   ;;  %s1381_s1 = inlined_call_operand.vmem [shape: bf16[128,512], index: 1, kind: input, shape index: {}]   ;;  %s1382_s0 = inlined_call_operand.vmem [shape: bf16[16,128], index: 0, kind: input, shape index: {}, may-alias: {0,5}]   ;;  %s1383_s3 = inlined_call_operand.vmem [shape: bf16[512,128], index: 3, kind: input, shape index: {}]   ;;  %s1384_s2 = inlined_call_operand.vmem [shape: f32[1,512], index: 2, kind: input, shape index: {}]   ;;  %s1385_s5 = inlined_call_operand.vmem [shape: bf16[16,128], index: 5, kind: input, shape index: {}, may-alias: {0,5}]   ;;  %s1386_s4 = inlined_call_operand.vmem [shape: f32[1,128], index: 4, kind: input, shape index: {}]   ;;  %s1387_s6 = inlined_call_operand.vmem [shape: f32[1,128], index: 6, kind: input, shape index: {}]   ;;  %s1388_s7 = inlined_call_operand.vmem [shape: f32[1,128], index: 7, kind: input, shape index: {}]   ;;  %s1389_s8 = inlined_call_operand.vmem [shape: bf16[16,128], index: 8, kind: output, shape index: {}]  }
   0x1   :  { %v965_v0 = vld [vmem:[%s1381_s1 + $0x4] ss:$16 sps:$4 sm:$0xff]   ;;  %290 = vmatprep.mubr.bf16.mxu0 %v1066_v1  ;;  %333 = vmatprep.mubr.bf16.mxu1 %v1066_v1  ;;  %v967_v2 = vld [vmem:[%s1381_s1 + $0xc] ss:$16 sps:$4 sm:$0xff]   ;;  %v969_v3 = vld [vmem:[%s1381_s1] ss:$16 sps:$4 sm:$0xff]  }
   0x2   :  { %258 = vmatprep.subr.bf16.mxu0 %v965_v0  ;;  %v970_v4 = vld [vmem:[%s1381_s1 + $0x8] ss:$16 sps:$4 sm:$0xff]   ;;  %301 = vmatprep.subr.bf16.mxu1 %v967_v2  ;;  %v971_v5 = vld [vmem:[%s1381_s1 + $0x24] ss:$16 sps:$4 sm:$0xff]   ;;  %v973_v6 = vld [vmem:[%s1381_s1 + $0x2c] ss:$16 sps:$4 sm:$0xff]   ;;  %v72_v2 = vlaneseq }
   0x3   :  { %259 = vmatpush1.bf16.msra.mxu0 %v969_v3  ;;  %302 = vmatpush1.bf16.msra.mxu1 %v970_v4  ;;  %v975_v7 = vld [vmem:[%s1381_s1 + $0x20] ss:$16 sps:$4 sm:$0xff]   ;;  %v976_v8 = vld [vmem:[%s1381_s1 + $0x28] ss:$16 sps:$4 sm:$0xff]   ;;  %v977_v9 = vld [vmem:[%s1381_s1 + $0x44] ss:$16 sps:$4 sm:$0xff]  }
   0x4   :  { %260 = vmatprep.subr.bf16.mxu0 %v971_v5  ;;  %303 = vmatprep.subr.bf16.mxu1 %v973_v6  ;;  %v979_v10 = vld [vmem:[%s1381_s1 + $0x4c] ss:$16 sps:$4 sm:$0xff]   ;;  %v981_v11 = vld [vmem:[%s1381_s1 + $0x40] ss:$16 sps:$4 sm:$0xff]   ;;  %v982_v12 = vld [vmem:[%s1381_s1 + $0x48] ss:$16 sps:$4 sm:$0xff]  }
   0x5   :  { %v983_v13 = vld [vmem:[%s1381_s1 + $0x64] ss:$16 sps:$4 sm:$0xff]   ;;  %v985_v14 = vld [vmem:[%s1381_s1 + $0x6c] ss:$16 sps:$4 sm:$0xff]   ;;  %v987_v15 = vld [vmem:[%s1381_s1 + $0x60] ss:$16 sps:$4 sm:$0xff]  }
   0x6   :  { %v988_v16 = vld [vmem:[%s1381_s1 + $0x68] ss:$16 sps:$4 sm:$0xff]   ;;  %v989_v17 = vld [vmem:[%s1381_s1 + $0x84] ss:$16 sps:$4 sm:$0xff]   ;;  %v991_v18 = vld [vmem:[%s1381_s1 + $0x8c] ss:$16 sps:$4 sm:$0xff]  }
   0x7   :  { %261 = vmatpush1.bf16.msra.mxu0 %v975_v7  ;;  %304 = vmatpush1.bf16.msra.mxu1 %v976_v8  ;;  %v993_v19 = vld [vmem:[%s1381_s1 + $0x80] ss:$16 sps:$4 sm:$0xff]   ;;  %v994_v20 = vld [vmem:[%s1381_s1 + $0x88] ss:$16 sps:$4 sm:$0xff]   ;;  %v995_v21 = vld [vmem:[%s1381_s1 + $0xa4] ss:$16 sps:$4 sm:$0xff]  }
   0x8   :  { %262 = vmatprep.subr.bf16.mxu0 %v977_v9  ;;  %305 = vmatprep.subr.bf16.mxu1 %v979_v10  ;;  %v997_v22 = vld [vmem:[%s1381_s1 + $0xac] ss:$16 sps:$4 sm:$0xff]   ;;  %v999_v23 = vld [vmem:[%s1381_s1 + $0xa0] ss:$16 sps:$4 sm:$0xff]   ;;  %v1000_v24 = vld [vmem:[%s1381_s1 + $0xa8] ss:$16 sps:$4 sm:$0xff]  }
   0x9   :  { %v1001_v25 = vld [vmem:[%s1381_s1 + $0xc4] ss:$16 sps:$4 sm:$0xff]   ;;  %v1003_v26 = vld [vmem:[%s1381_s1 + $0xcc] ss:$16 sps:$4 sm:$0xff]   ;;  %v1005_v27 = vld [vmem:[%s1381_s1 + $0xc0] ss:$16 sps:$4 sm:$0xff]  }
   0xa   :  { %v1006_v28 = vld [vmem:[%s1381_s1 + $0xc8] ss:$16 sps:$4 sm:$0xff]   ;;  %v1007_v29 = vld [vmem:[%s1381_s1 + $0xe4] ss:$16 sps:$4 sm:$0xff]   ;;  %v1009_v30 = vld [vmem:[%s1381_s1 + $0xec] ss:$16 sps:$4 sm:$0xff]  }
   0xb   :  { %263 = vmatpush1.bf16.msra.mxu0 %v981_v11  ;;  %306 = vmatpush1.bf16.msra.mxu1 %v982_v12  ;;  %v1011_v31 = vld [vmem:[%s1381_s1 + $0xe0] ss:$16 sps:$4 sm:$0xff]   ;;  %v1012_v32 = vld [vmem:[%s1381_s1 + $0xe8] ss:$16 sps:$4 sm:$0xff]   ;;  %v73_v3 = vshrl.u32 %v72_v2, 7 }
   0xc   :  { %264 = vmatprep.subr.bf16.mxu0 %v983_v13  ;;  %307 = vmatprep.subr.bf16.mxu1 %v985_v14  ;;  %v1013_v33 = vld [vmem:[%s1382_s0] sm:$0xff]   ;;  %v1018_v38 = vld [vmem:[%s1383_s3 + $0x48] sm:$0xff]   ;;  %v1022_v42 = vld [vmem:[%s1383_s3 + $0x50] sm:$0xff]  }
   0xd   :  { %v1014_v34 = vld [vmem:[%s1383_s3 + $0x40] sm:$0xff]   ;;  %v1019_v39 = vld [vmem:[%s1383_s3 + $0xc8] sm:$0xff]   ;;  %v1023_v43 = vld [vmem:[%s1383_s3 + $0xd0] sm:$0xff]   ;;  %v74_v4 = vsub.s32 0, %v73_v3  ;;  %v82_v5 = vsub.s32 2, %v73_v3  ;;  %v78_v7 = vsub.s32 1, %v73_v3 }
   0xe   :  { %v1015_v35 = vld [vmem:[%s1383_s3 + $0xc0] sm:$0xff]   ;;  %v1020_v40 = vld [vmem:[%s1383_s3 + $0x8] sm:$0xff]   ;;  %v1024_v44 = vld [vmem:[%s1383_s3 + $0x10] sm:$0xff]   ;;  %v86_v8 = vsub.s32 3, %v73_v3 }
   0xf   :  { %265 = vmatpush1.bf16.msra.mxu0 %v987_v15  ;;  %308 = vmatpush1.bf16.msra.mxu1 %v988_v16  ;;  %v1016_v36 = vld [vmem:[%s1383_s3] sm:$0xff]   ;;  %v1021_v41 = vld [vmem:[%s1383_s3 + $0x88] sm:$0xff]   ;;  %v1025_v45 = vld [vmem:[%s1383_s3 + $0x90] sm:$0xff]  }
  0x10   :  { %266 = vmatprep.subr.bf16.mxu0 %v989_v17  ;;  %309 = vmatprep.subr.bf16.mxu1 %v991_v18  ;;  %v1017_v37 = vld [vmem:[%s1383_s3 + $0x80] sm:$0xff]   ;;  %v1026_v46 = vld [vmem:[%s1383_s3 + $0x58] sm:$0xff]   ;;  %v1034_v54 = vld [vmem:[%s1383_s3 + $0x68] sm:$0xff]  }
  0x11   :  { %v1027_v47 = vld [vmem:[%s1383_s3 + $0xd8] sm:$0xff]   ;;  %v1030_v50 = vld [vmem:[%s1383_s3 + $0x60] sm:$0xff]   ;;  %v1035_v55 = vld [vmem:[%s1383_s3 + $0xe8] sm:$0xff]  }
  0x12   :  { %v1028_v48 = vld [vmem:[%s1383_s3 + $0x18] sm:$0xff]   ;;  %v1031_v51 = vld [vmem:[%s1383_s3 + $0xe0] sm:$0xff]   ;;  %v1036_v56 = vld [vmem:[%s1383_s3 + $0x28] sm:$0xff]  }
  0x13   :  { %267 = vmatpush1.bf16.msra.mxu0 %v993_v19  ;;  %310 = vmatpush1.bf16.msra.mxu1 %v994_v20  ;;  %v1029_v49 = vld [vmem:[%s1383_s3 + $0x98] sm:$0xff]   ;;  %v1032_v52 = vld [vmem:[%s1383_s3 + $0x20] sm:$0xff]   ;;  %v1037_v57 = vld [vmem:[%s1383_s3 + $0xa8] sm:$0xff]  }
  0x14   :  { %268 = vmatprep.subr.bf16.mxu0 %v995_v21  ;;  %311 = vmatprep.subr.bf16.mxu1 %v997_v22  ;;  %v1033_v53 = vld [vmem:[%s1383_s3 + $0xa0] sm:$0xff]   ;;  %v1038_v58 = vld [vmem:[%s1383_s3 + $0x70] sm:$0xff]   ;;  %v1042_v62 = vld [vmem:[%s1383_s3 + $0x78] sm:$0xff]  }
  0x15   :  { %v1039_v59 = vld [vmem:[%s1383_s3 + $0xf0] sm:$0xff]   ;;  %v1043_v63 = vld [vmem:[%s1383_s3 + $0xf8] sm:$0xff]   ;;  %v70_v6 = vld [vmem:[%s1384_s2] sm:$0xf] }
  0x16   :  { %v1040_v60 = vld [vmem:[%s1383_s3 + $0x30] sm:$0xff]   ;;  %v1044_v0 = vld [vmem:[%s1383_s3 + $0x38] sm:$0xff]   ;;  %v75_v9 = vrot.slane %v70_v6, %v74_v4  ;;  %v83_v10 = vrot.slane %v70_v6, %v82_v5  ;;  %v79_v11 = vrot.slane %v70_v6, %v78_v7  ;;  %v87_v12 = vrot.slane %v70_v6, %v86_v8 }
  0x17   :  { %269 = vmatpush1.bf16.msra.mxu0 %v999_v23  ;;  %312 = vmatpush1.bf16.msra.mxu1 %v1000_v24  ;;  %v1041_v61 = vld [vmem:[%s1383_s3 + $0xb0] sm:$0xff]   ;;  %v1045_v1 = vld [vmem:[%s1383_s3 + $0xb8] sm:$0xff]  }
  0x18   :  { %270 = vmatprep.subr.bf16.mxu0 %v1001_v25  ;;  %313 = vmatprep.subr.bf16.mxu1 %v1003_v26 }
  0x1b   :  { %271 = vmatpush1.bf16.msra.mxu0 %v1005_v27  ;;  %314 = vmatpush1.bf16.msra.mxu1 %v1006_v28 }
  0x1c   :  { %272 = vmatprep.subr.bf16.mxu0 %v1007_v29  ;;  %315 = vmatprep.subr.bf16.mxu1 %v1009_v30 }
  0x1f   :  { %273 = vmatpush1.bf16.msra.mxu0 %v1011_v31  ;;  %316 = vmatpush1.bf16.msra.mxu1 %v1012_v32 }
  0x20   :  { %920 = vmatprep.subr.bf16.mxu0 %v1014_v34  ;;  %942 = vmatprep.subr.bf16.mxu1 %v1015_v35 }
  0x22   :  { %291 = vmatmul.mubr.bf16.vlgmr.msra.gmra.mrb[0].mxu0 %v1013_v33  ;;  %334 = vmatmul.mubr.bf16.vlgmr.msra.gmra.mrb[0].mxu1 %v1013_v33 }
  0x23   :  { %921 = vmatpush3.bf16.msra.mxu0 %v1016_v36  ;;  %943 = vmatpush3.bf16.msra.mxu1 %v1017_v37 }
  0x24   :  { %922 = vmatprep.subr.bf16.mxu0 %v1018_v38  ;;  %944 = vmatprep.subr.bf16.mxu1 %v1019_v39 }
  0x27   :  { %923 = vmatpush3.bf16.msra.mxu0 %v1020_v40  ;;  %945 = vmatpush3.bf16.msra.mxu1 %v1021_v41 }
  0x28   :  { %924 = vmatprep.subr.bf16.mxu0 %v1022_v42  ;;  %946 = vmatprep.subr.bf16.mxu1 %v1023_v43 }
  0x2b   :  { %925 = vmatpush3.bf16.msra.mxu0 %v1024_v44  ;;  %947 = vmatpush3.bf16.msra.mxu1 %v1025_v45 }
  0x2c   :  { %926 = vmatprep.subr.bf16.mxu0 %v1026_v46  ;;  %948 = vmatprep.subr.bf16.mxu1 %v1027_v47 }
  0x2f   :  { %927 = vmatpush3.bf16.msra.mxu0 %v1028_v48  ;;  %949 = vmatpush3.bf16.msra.mxu1 %v1029_v49 }
  0x30   :  { %928 = vmatprep.subr.bf16.mxu0 %v1030_v50  ;;  %950 = vmatprep.subr.bf16.mxu1 %v1031_v51 }
  0x33   :  { %929 = vmatpush3.bf16.msra.mxu0 %v1032_v52  ;;  %951 = vmatpush3.bf16.msra.mxu1 %v1033_v53 }
  0x34   :  { %930 = vmatprep.subr.bf16.mxu0 %v1034_v54  ;;  %952 = vmatprep.subr.bf16.mxu1 %v1035_v55 }
  0x37   :  { %931 = vmatpush3.bf16.msra.mxu0 %v1036_v56  ;;  %953 = vmatpush3.bf16.msra.mxu1 %v1037_v57 }
  0x38   :  { %932 = vmatprep.subr.bf16.mxu0 %v1038_v58  ;;  %954 = vmatprep.subr.bf16.mxu1 %v1039_v59 }
  0x3b   :  { %933 = vmatpush3.bf16.msra.mxu0 %v1040_v60  ;;  %955 = vmatpush3.bf16.msra.mxu1 %v1041_v61 }
  0x3c   :  { %934 = vmatprep.subr.bf16.mxu0 %v1042_v62  ;;  %956 = vmatprep.subr.bf16.mxu1 %v1043_v63 }
  0x3f   :  { %935 = vmatpush3.bf16.msra.mxu0 %v1044_v0  ;;  %957 = vmatpush3.bf16.msra.mxu1 %v1045_v1 }
  0xf5   :  { %v292_v13 = vpop.f32.mrb[0].mxu0  ;;  %v335_v14 = vpop.f32.mrb[0].mxu1 }
  0xf6   :  { %v1310_v15 = vadd.f32 %v292_v13, %v75_v9  ;;  %v1312_v16 = vadd.f32 %v335_v14, %v83_v10  ;;  %v294_v17 = vpop.f32.mrb[1].mxu0  ;;  %v337_v18 = vpop.f32.mrb[1].mxu1 }
  0xf7   :  { %v1314_v19 = vadd.f32 %v294_v17, %v79_v11  ;;  %v1316_v20 = vadd.f32 %v337_v18, %v87_v12  ;;  %v296_v21 = vpop.f32.mrb[2].mxu0  ;;  %v339_v22 = vpop.f32.mrb[2].mxu1 }
  0xf8   :  { %v344_v23 = vmul.f32 %v1310_v15, %v1310_v15  ;;  %v346_v24 = vmul.f32 %v1312_v16, %v1312_v16  ;;  %v1322_v25 = vadd.f32 %v296_v21, %v75_v9  ;;  %v1324_v26 = vadd.f32 %v339_v22, %v83_v10  ;;  %v298_v27 = vpop.f32.mrb[3].mxu0  ;;  %v341_v28 = vpop.f32.mrb[3].mxu1 }
  0xf9   :  { %v345_v29 = vmul.f32 %v1314_v19, %v1314_v19  ;;  %v347_v30 = vmul.f32 %v1316_v20, %v1316_v20  ;;  %v1330_v31 = vadd.f32 %v298_v27, %v79_v11  ;;  %v1332_v32 = vadd.f32 %v341_v28, %v87_v12 }
  0xfa   :  { %v352_v33 = vmul.f32 %v344_v23, %v1310_v15  ;;  %v354_v34 = vmul.f32 %v346_v24, %v1312_v16  ;;  %v348_v35 = vmul.f32 %v1322_v25, %v1322_v25  ;;  %v350_v36 = vmul.f32 %v1324_v26, %v1324_v26 }
  0xfb   :  { %v353_v37 = vmul.f32 %v345_v29, %v1314_v19  ;;  %v355_v38 = vmul.f32 %v347_v30, %v1316_v20  ;;  %v349_v39 = vmul.f32 %v1330_v31, %v1330_v31  ;;  %v351_v40 = vmul.f32 %v1332_v32, %v1332_v32 }
  0xfc   :  { %v360_v41 = vmul.f32 0.044715, %v352_v33  ;;  %v362_v42 = vmul.f32 0.044715, %v354_v34  ;;  %v356_v43 = vmul.f32 %v348_v35, %v1322_v25  ;;  %v358_v44 = vmul.f32 %v350_v36, %v1324_v26 }
  0xfd   :  { %v361_v45 = vmul.f32 0.044715, %v353_v37  ;;  %v363_v46 = vmul.f32 0.044715, %v355_v38  ;;  %v357_v47 = vmul.f32 %v349_v39, %v1330_v31  ;;  %v359_v48 = vmul.f32 %v351_v40, %v1332_v32 }
  0xfe   :  { %v368_v49 = vadd.f32 %v360_v41, %v1310_v15  ;;  %v370_v50 = vadd.f32 %v362_v42, %v1312_v16  ;;  %v364_v51 = vmul.f32 0.044715, %v356_v43  ;;  %v366_v52 = vmul.f32 0.044715, %v358_v44 }
  0xff   :  { %v369_v53 = vadd.f32 %v361_v45, %v1314_v19  ;;  %v371_v54 = vadd.f32 %v363_v46, %v1316_v20  ;;  %v365_v55 = vmul.f32 0.044715, %v357_v47  ;;  %v367_v56 = vmul.f32 0.044715, %v359_v48 }
 0x100   :  { %v376_v57 = vmul.f32 0.7978846, %v368_v49  ;;  %v378_v58 = vmul.f32 0.7978846, %v370_v50  ;;  %v372_v59 = vadd.f32 %v364_v51, %v1322_v25  ;;  %v374_v60 = vadd.f32 %v366_v52, %v1324_v26 }
 0x101   :  { %v377_v61 = vmul.f32 0.7978846, %v369_v53  ;;  %v379_v62 = vmul.f32 0.7978846, %v371_v54  ;;  %v373_v63 = vadd.f32 %v365_v55, %v1330_v31  ;;  %v375_v0 = vadd.f32 %v367_v56, %v1332_v32  ;;  %v904_v53 = vld [vmem:[%s1386_s4] ss:$0 sm:$0xff] }
 0x102   :  { %1046 = vtanh.f32 %v376_v57  ;;  %v380_v1 = vmul.f32 0.7978846, %v372_v59  ;;  %v382_v2 = vmul.f32 0.7978846, %v374_v60 }
 0x103   :  { %1048 = vtanh.f32 %v378_v58  ;;  %v381_v3 = vmul.f32 0.7978846, %v373_v63  ;;  %v383_v4 = vmul.f32 0.7978846, %v375_v0 }
 0x104   :  { %1050 = vtanh.f32 %v377_v61 }
 0x105   :  { %1052 = vtanh.f32 %v379_v62 }
 0x106   :  { %1054 = vtanh.f32 %v380_v1 }
 0x107   :  { %1056 = vtanh.f32 %v382_v2 }
 0x108   :  { %1058 = vtanh.f32 %v381_v3 }
 0x109   :  { %1060 = vtanh.f32 %v383_v4 }
 0x10c   :  { %v1047_v5 = vpop.eup %1046 }
 0x10d   :  { %v1049_v6 = vpop.eup %1048  ;;  %v392_v7 = vadd.f32 1.0, %v1047_v5 }
 0x10e   :  { %v1051_v8 = vpop.eup %1050  ;;  %v394_v9 = vadd.f32 1.0, %v1049_v6 }
 0x10f   :  { %v1053_v10 = vpop.eup %1052  ;;  %v393_v11 = vadd.f32 1.0, %v1051_v8  ;;  %v400_v17 = vmul.f32 0.5, %v392_v7 }
 0x110   :  { %v1055_v12 = vpop.eup %1054  ;;  %v395_v13 = vadd.f32 1.0, %v1053_v10  ;;  %v402_v22 = vmul.f32 0.5, %v394_v9 }
 0x111   :  { %v1057_v14 = vpop.eup %1056  ;;  %v396_v18 = vadd.f32 1.0, %v1055_v12  ;;  %v401_v29 = vmul.f32 0.5, %v393_v11  ;;  %v408_v35 = vmul.f32 %v400_v17, %v1310_v15  ;;  %v905_v17 = vld [vmem:[%s1387_s6] ss:$0 sm:$0xff] }
 0x112   :  { %v1059_v21 = vpop.eup %1058  ;;  %v398_v23 = vadd.f32 1.0, %v1057_v14  ;;  %v403_v34 = vmul.f32 0.5, %v395_v13  ;;  %v410_v38 = vmul.f32 %v402_v22, %v1312_v16 }
 0x113   :  { %v1061_v24 = vpop.eup %1060  ;;  %v404_v27 = vmul.f32 0.5, %v396_v18  ;;  %v397_v28 = vadd.f32 1.0, %v1059_v21  ;;  %v409_v41 = vmul.f32 %v401_v29, %v1314_v19 }
 0x114   :  { %v406_v30 = vmul.f32 0.5, %v398_v23  ;;  %v399_v33 = vadd.f32 1.0, %v1061_v24  ;;  %v411_v44 = vmul.f32 %v403_v34, %v1316_v20  ;;  %v906_v23 = vld [vmem:[%s1388_s7] ss:$0 sm:$0xff] }
 0x115   :  { %v412_v36 = vmul.f32 %v404_v27, %v1322_v25  ;;  %v405_v37 = vmul.f32 0.5, %v397_v28 }
 0x116   :  { %v414_v39 = vmul.f32 %v406_v30, %v1324_v26  ;;  %v407_v40 = vmul.f32 0.5, %v399_v33 }
 0x117   :  { %v413_v42 = vmul.f32 %v405_v37, %v1330_v31  ;;  %v418_v43 = vpack.c.bf16 %v412_v36, %v408_v35  ;;  %v912_v31 = vld [vmem:[%s1385_s5] sm:$0xff]  }
 0x118   :  { %v415_v45 = vmul.f32 %v407_v40, %v1332_v32  ;;  %v420_v46 = vpack.c.bf16 %v414_v39, %v410_v38  ;;  %v913_v56 = vunpack.c.l.bf16 %v912_v31  ;;  %v914_v61 = vunpack.c.h.bf16 %v912_v31 }
 0x119   :  { %v419_v47 = vpack.c.bf16 %v413_v42, %v409_v41 }
 0x11a   :  { %v421_v15 = vpack.c.bf16 %v415_v45, %v411_v44 }
 0x11b   :  { %710 = vmatprep.mubr.bf16.mxu0 %v419_v47 }
 0x11c   :  { %751 = vmatprep.mubr.bf16.mxu1 %v421_v15  ;;  %711 = vmatmul.mubr.bf16.vlgmr.msra.gmra.mrb[4].mxu0 %v418_v43 }
 0x11d   :  { %752 = vmatmul.mubr.bf16.vlgmr.msra.gmra.mrb[4].mxu1 %v420_v46 }
 0x1ef   :  { %v936_v16 = vpop.f32.mrb[4].mxu0 }
 0x1f0   :  { %v958_v25 = vpop.f32.mrb[4].mxu1  ;;  %v937_v26 = vpop.f32.mrb[5].mxu0 }
 0x1f1   :  { %v938_v48 = vadd.f32 %v937_v26, %v936_v16  ;;  %v959_v49 = vpop.f32.mrb[5].mxu1  ;;  %v939_v19 = vpop.f32.mrb[6].mxu0 }
 0x1f2   :  { %v960_v20 = vadd.f32 %v959_v49, %v958_v25  ;;  %v961_v50 = vpop.f32.mrb[6].mxu1  ;;  %v940_v32 = vpop.f32.mrb[7].mxu0 }
 0x1f3   :  { %v941_v51 = vadd.f32 %v940_v32, %v939_v19  ;;  %v962_v52 = vpop.f32.mrb[7].mxu1 }
 0x1f4   :  { %v754_v54 = vadd.f32 %v960_v20, %v938_v48  ;;  %v963_v55 = vadd.f32 %v962_v52, %v961_v50 }
 0x1f6   :  { %v757_v57 = vadd.f32 %v963_v55, %v941_v51  ;;  %v776_v58 = vadd.f32 %v904_v53, %v754_v54 }
 0x1f8   :  { %v782_v59 = vadd.f32 %v913_v56, %v776_v58  ;;  %v777_v60 = vadd.f32 %v904_v53, %v757_v57 }
 0x1fa   :  { %784 = vadd.xlane.f32.xlu0 %v782_v59  ;;  %v783_v62 = vadd.f32 %v914_v61, %v777_v60 }
 0x1fe   :  { %786 = vadd.xlane.f32.xlu0 %v783_v62 }
 0x287   :  { %v785_v63 = vpop.xlane.xlu0 %784 }
 0x288   :  { %v789_v0 = vmul.f32 0.0078125, %v785_v63 }
 0x28a   :  { %v791_v1 = vsub.f32 %v782_v59, %v789_v0 }
 0x28b   :  { %v787_v2 = vpop.xlane.xlu0 %786 }
 0x28c   :  { %v790_v3 = vmul.f32 0.0078125, %v787_v2  ;;  %v793_v4 = vmul.f32 %v791_v1, %v791_v1 }
 0x28e   :  { %v792_v5 = vsub.f32 %v783_v62, %v790_v3  ;;  %795 = vadd.xlane.f32.xlu1 %v793_v4 }
 0x290   :  { %v794_v6 = vmul.f32 %v792_v5, %v792_v5 }
 0x292   :  { %797 = vadd.xlane.f32.xlu1 %v794_v6 }
 0x31b   :  { %v796_v7 = vpop.xlane.xlu1 %795 }
 0x31c   :  { %v799_v8 = vmul.f32 0.0078125, %v796_v7 }
 0x31e   :  { %v801_v9 = vadd.f32 1e-12, %v799_v8 }
 0x31f   :  { %v798_v10 = vpop.xlane.xlu1 %797 }
 0x320   :  { %1062 = vrsqrt.f32 %v801_v9  ;;  %v800_v11 = vmul.f32 0.0078125, %v798_v10 }
 0x322   :  { %v802_v12 = vadd.f32 1e-12, %v800_v11 }
 0x324   :  { %1064 = vrsqrt.f32 %v802_v12 }
 0x32a   :  { %v1063_v13 = vpop.eup %1062 }
 0x32b   :  { %v805_v14 = vmul.f32 %v1063_v13, %v791_v1 }
 0x32d   :  { %v814_v21 = vmul.f32 %v905_v17, %v805_v14 }
 0x32e   :  { %v1065_v18 = vpop.eup %1064 }
 0x32f   :  { %v806_v22 = vmul.f32 %v1065_v18, %v792_v5  ;;  %v823_v27 = vadd.f32 %v906_v23, %v814_v21 }
 0x331   :  { %v815_v24 = vmul.f32 %v905_v17, %v806_v22 }
 0x333   :  { %v824_v28 = vadd.f32 %v906_v23, %v815_v24 }
 0x335   :  { %v918_v29 = vpack.c.bf16 %v824_v28, %v823_v27 }
 0x337   :  { %919 = vst [vmem:[%s1389_s8] sm:$0xff] %v918_v29  }

</bundles_post_ra>
